<compile_context>
chip_gen: v5e
topology: v5e:2x2
jax: 0.10.0
libtpu: 0.0.40
codegen_flags: <defaults>
</compile_context>

<pallas_src>
import functools

import jax
import jax.numpy as jnp
from jax import lax
from jax.experimental import pallas as pl
from jax.experimental.pallas import tpu as pltpu


def _round_up(x, m):
    return (x + m - 1) // m * m


def _fused_conv_bn_relu_kernel(p_ref, w_ref, gamma_ref, beta_ref, o_ref,
                               y_scr, sum_scr, ssq_scr,
                               *, n_tiles, co8, inv_cnt, eps):
    """Fused conv (im2col matmul) + batch-stats BN + ReLU in one grid sweep.

    p_ref:     (TM, Kp)            bf16 im2col patch tile
    w_ref:     (Kp, Cp)            bf16 weight (resident, single-buffered)
    gamma_ref: (1, Cp), beta_ref: (1, Cp)   f32 BN affine params (zero-padded)
    o_ref:     (n_tiles, Co8, TM)  f32 channel-major output, VMEM-resident,
                                   written once on the last step (lane-dense)
    y_scr:     (n_tiles, TM, Cp)   f32 conv output (never touches HBM)
    sum_scr/ssq_scr: (8, Cp)       f32 running per-channel sum / sum-of-squares
    """
    i = pl.program_id(0)
    tm = p_ref.shape[0]
    cp = w_ref.shape[1]

    @pl.when(i == 0)
    def _init():
        sum_scr[...] = jnp.zeros_like(sum_scr)
        ssq_scr[...] = jnp.zeros_like(ssq_scr)

    # One fused MXU matmul per tile (bf16 operands, f32 accumulation).
    acc = jnp.dot(p_ref[...], w_ref[...], preferred_element_type=jnp.float32)
    y_scr[i] = acc

    # Per-tile channel stats folded onto 8 sublanes with VPU adds only (f32).
    # TODO(synk): one-pass E[x^2]-E[x]^2 variance; switch to centered/Welford
    # merge if |mean| >> std when generalizing beyond this config.
    a3 = acc.reshape(tm // 8, 8, cp)
    sum_scr[...] += jnp.sum(a3, axis=0)
    ssq_scr[...] += jnp.sum(a3 * a3, axis=0)

    # Last step: finish the 8->1 sublane reduction, fold gamma/beta into one
    # scale/shift FMA, normalize + ReLU straight out of VMEM, emit channel-major.
    @pl.when(i == n_tiles - 1)
    def _finalize():
        s = jnp.sum(sum_scr[...], axis=0, keepdims=True)       # (1, Cp)
        ss = jnp.sum(ssq_scr[...], axis=0, keepdims=True)      # (1, Cp)
        mean = s * inv_cnt
        var = jnp.maximum(ss * inv_cnt - mean * mean, 0.0)     # biased (BN training)
        rstd = lax.rsqrt(var + eps)
        scale = gamma_ref[...] * rstd                          # (1, Cp)
        shift = beta_ref[...] - mean * scale                   # (1, Cp)
        for t in range(n_tiles):   # small static count, unrolled at trace time
            y = jnp.maximum(y_scr[t] * scale + shift, 0.0)     # (TM, Cp) f32
            # XLU transpose; only the Co8 real channel rows are stored so the
            # HBM write skips the 128-channel padding (lane dim stays TM-dense).
            o_ref[t] = jnp.transpose(y)[:co8, :]


def conv_norm_act_2d(x_nchw, weight_oihw, gamma, beta, *, eps=1e-5,
                     mxu_dtype=jnp.bfloat16):
    """Forward pass matching the PyTorch module: conv (stride=1, 'same', no
    bias) -> BatchNorm2d with batch statistics -> ReLU. NCHW in / NCHW out."""
    N, Cin, H, W = x_nchw.shape
    Cout, Cin_w, KH, KW = weight_oihw.shape
    assert Cin_w == Cin
    assert KH % 2 == 1 and KW % 2 == 1, "'same' implemented for odd kernels"
    # TODO(synk): stride>1 / dilation>1 / groups>1 paths of the generic module
    # are not implemented (unused here); running_mean/var buffers not produced.

    LANE = 128
    M = N * H * W
    Kc = KH * KW * Cin
    Kp = _round_up(Kc, LANE)      # keep 128-wide; do NOT pad operands to 256
    Cp = _round_up(Cout, LANE)
    Co8 = _round_up(Cout, 8)

    # Row tiling: zero-pad M up to a multiple of TM (zero patch rows contribute
    # exactly 0 to sum/ssq and are sliced away) instead of tiny-tile fallback.
    TM = 256 if M >= 256 else _round_up(M, 8)
    M_pad = _round_up(M, TM)
    n_tiles = M_pad // TM

    # ---- glue (plain JAX on tiny arrays): NCHW->NHWC, 'same' pad, im2col ----
    # TODO(synk): for large Cin/H/W, gather the KH*KW taps in-kernel from an
    # NHWC halo tile instead of materializing the im2col patches in HBM.
    x_nhwc = jnp.transpose(x_nchw, (0, 2, 3, 1)).astype(jnp.float32)
    ph, pw = (KH - 1) // 2, (KW - 1) // 2
    x_pad = jnp.pad(x_nhwc, ((0, 0), (ph, KH - 1 - ph), (pw, KW - 1 - pw), (0, 0)))
    taps = [x_pad[:, kh:kh + H, kw:kw + W, :]
            for kh in range(KH) for kw in range(KW)]
    patches = jnp.concatenate(taps, axis=-1).reshape(M, Kc)
    patches = jnp.pad(patches, ((0, M_pad - M), (0, Kp - Kc))).astype(mxu_dtype)

    # OIHW -> (KH*KW*Cin, Cout), zero-padded to (Kp, Cp).
    w = jnp.transpose(weight_oihw, (2, 3, 1, 0)).reshape(Kc, Cout)
    w = jnp.pad(w.astype(jnp.float32), ((0, Kp - Kc), (0, Cp - Cout))).astype(mxu_dtype)

    # gamma zero-padded => padded channels get scale=0, shift=0 (no leakage).
    gamma_p = jnp.pad(gamma.astype(jnp.float32), (0, Cp - Cout)).reshape(1, Cp)
    beta_p = jnp.pad(beta.astype(jnp.float32), (0, Cp - Cout)).reshape(1, Cp)

    kernel = functools.partial(_fused_conv_bn_relu_kernel, n_tiles=n_tiles,
                               co8=Co8, inv_cnt=1.0 / float(M), eps=float(eps))

    def run(weight_spec):
        return pl.pallas_call(
            kernel,
            grid=(n_tiles,),
            in_specs=(
                pl.BlockSpec((TM, Kp), lambda i: (i, 0)),
                weight_spec,
                pl.BlockSpec((1, Cp), lambda i: (0, 0)),
                pl.BlockSpec((1, Cp), lambda i: (0, 0)),
            ),
            # Whole output stays VMEM-resident; one lane-dense HBM write at end.
            out_specs=pl.BlockSpec((n_tiles, Co8, TM), lambda i: (0, 0, 0)),
            out_shape=jax.ShapeDtypeStruct((n_tiles, Co8, TM), jnp.float32),
            scratch_shapes=[
                pltpu.VMEM((n_tiles, TM, Cp), jnp.float32),  # conv out (VMEM only)
                pltpu.VMEM((8, Cp), jnp.float32),            # channel sums
                pltpu.VMEM((8, Cp), jnp.float32),            # channel sums of squares
            ],
            compiler_params=pltpu.CompilerParams(
                dimension_semantics=("arbitrary",),          # stats carried across steps
                vmem_limit_bytes=32 * 1024 * 1024,           # v5e/v6e/v7x-safe budget
            ),
        )(patches, w, gamma_p, beta_p)

    try:
        # Weight index_map is constant -> single-buffer it (one copy, one DMA).
        out_k = run(pl.BlockSpec((Kp, Cp), lambda i: (0, 0),
                                 pipeline_mode=pl.Buffered(1)))
    except Exception:
        # TODO(synk): fallback for JAX versions without per-operand pipeline_mode.
        out_k = run(pl.BlockSpec((Kp, Cp), lambda i: (0, 0)))

    # (n_tiles, Co8, TM) channel-major -> (N, Cout, H, W); all ops on tiny arrays.
    out = jnp.transpose(out_k, (1, 0, 2)).reshape(Co8, M_pad)[:Cout, :M]
    return out.reshape(Cout, N, H, W).transpose(1, 0, 2, 3)


def reference(x_nchw, weight_oihw, gamma, beta, *, eps=1e-5, mxu_dtype=jnp.float32):
    """Pure-JAX reference (lax conv). mxu_dtype lets us precision-match the
    kernel's bf16 MXU operands while keeping f32 accumulation + f32 BN math."""
    y = lax.conv_general_dilated(
        x_nchw.astype(mxu_dtype), weight_oihw.astype(mxu_dtype),
        window_strides=(1, 1), padding="SAME",
        dimension_numbers=("NCHW", "OIHW", "NCHW"),
        preferred_element_type=jnp.float32)
    mean = jnp.mean(y, axis=(0, 2, 3), keepdims=True)
    var = jnp.mean((y - mean) ** 2, axis=(0, 2, 3), keepdims=True)
    y = (y - mean) * lax.rsqrt(var + eps)
    y = y * gamma.reshape(1, -1, 1, 1) + beta.reshape(1, -1, 1, 1)
    return jnp.maximum(y, 0.0)


if __name__ == "__main__":
    N, Cin, H, W = 2, 4, 16, 16
    Cout, K = 8, 3

    key = jax.random.PRNGKey(0)
    kx, kw = jax.random.split(key)
    x = jax.random.normal(kx, (N, Cin, H, W), dtype=jnp.float32)
    weight = jax.random.normal(kw, (Cout, Cin, K, K), dtype=jnp.float32) * 0.1
    gamma = jnp.ones((Cout,), dtype=jnp.float32)   # BN affine init
    beta = jnp.zeros((Cout,), dtype=jnp.float32)

    out = jax.block_until_ready(conv_norm_act_2d(x, weight, gamma, beta))
    assert out.shape == (N, Cout, H, W)
    assert bool(jnp.all(jnp.isfinite(out)))

    # Precision-matched check (reference also feeds the matmul bf16 operands).
    ref_bf16 = reference(x, weight, gamma, beta, mxu_dtype=jnp.bfloat16)
    err_bf16 = float(jnp.max(jnp.abs(out - ref_bf16)))
    assert err_bf16 < 2e-3, f"bf16-matched reference mismatch: {err_bf16}"

    # Fidelity to the all-f32 PyTorch module (loose tol: bf16 MXU operands).
    ref_f32 = reference(x, weight, gamma, beta, mxu_dtype=jnp.float32)
    err_f32 = float(jnp.max(jnp.abs(out - ref_f32)))
    assert err_f32 < 1e-1, f"f32 reference mismatch: {err_f32}"

    print("KERNEL_OK")
</pallas_src>

<mosaic_0001>
module attributes {stable_mosaic.version = 11 : i64} {
  func.func @_fused_conv_bn_relu_kernel(%arg0: i32, %arg1: memref<256x128xbf16, #tpu.memory_space<vmem>>, %arg2: memref<128x128xbf16, #tpu.memory_space<vmem>>, %arg3: memref<1x128xf32, #tpu.memory_space<vmem>>, %arg4: memref<1x128xf32, #tpu.memory_space<vmem>>, %arg5: memref<2x8x256xf32, #tpu.memory_space<vmem>>, %arg6: memref<2x256x128xf32, #tpu.memory_space<vmem>>, %arg7: memref<8x128xf32, #tpu.memory_space<vmem>>, %arg8: memref<8x128xf32, #tpu.memory_space<vmem>>) attributes {dimension_semantics = [#tpu.dimension_semantics<arbitrary>], iteration_bounds = array<i64: 2>, scalar_prefetch = 0 : i64, scratch_operands = 3 : i64, tpu.core_type = #tpu.core_type<tc>, window_params = [{transform_indices = @transform_0, window_bounds = array<i64: 256, 128>}, {pipeline_mode = #tpu.pipeline_mode<synchronous>, transform_indices = @transform_1, window_bounds = array<i64: 128, 128>}, {pipeline_mode = #tpu.pipeline_mode<synchronous>, transform_indices = @transform_2, window_bounds = array<i64: 1, 128>}, {pipeline_mode = #tpu.pipeline_mode<synchronous>, transform_indices = @transform_3, window_bounds = array<i64: 1, 128>}, {pipeline_mode = #tpu.pipeline_mode<synchronous>, transform_indices = @transform_4, window_bounds = array<i64: 2, 8, 256>}]} {
    %c0_i32 = arith.constant 0 : i32
    %0 = arith.cmpi eq, %arg0, %c0_i32 : i32
    %1 = arith.extui %0 : i1 to i32
    %c0_i32_0 = arith.constant 0 : i32
    %2 = arith.cmpi ne, %1, %c0_i32_0 : i32
    scf.if %2 {
      %cst_17 = arith.constant 0.000000e+00 : f32
      %23 = vector.broadcast %cst_17 : f32 to vector<8x128xf32>
      %c0_18 = arith.constant 0 : index
      %c0_19 = arith.constant 0 : index
      %24 = vector.load %arg7[%c0_18, %c0_19] : memref<8x128xf32, #tpu.memory_space<vmem>>, vector<8x128xf32>
      tpu.vector_store %arg7[%c0_18, %c0_19], %23 {strides = array<i32>} : memref<8x128xf32, #tpu.memory_space<vmem>>, vector<8x128xf32>,
      %cst_20 = arith.constant 0.000000e+00 : f32
      %25 = vector.broadcast %cst_20 : f32 to vector<8x128xf32>
      %c0_21 = arith.constant 0 : index
      %c0_22 = arith.constant 0 : index
      %26 = vector.load %arg8[%c0_21, %c0_22] : memref<8x128xf32, #tpu.memory_space<vmem>>, vector<8x128xf32>
      tpu.vector_store %arg8[%c0_21, %c0_22], %25 {strides = array<i32>} : memref<8x128xf32, #tpu.memory_space<vmem>>, vector<8x128xf32>,
    } else {
    }
    %c0 = arith.constant 0 : index
    %c0_1 = arith.constant 0 : index
    %3 = vector.load %arg1[%c0, %c0_1] : memref<256x128xbf16, #tpu.memory_space<vmem>>, vector<256x128xbf16>
    %c0_2 = arith.constant 0 : index
    %c0_3 = arith.constant 0 : index
    %4 = vector.load %arg2[%c0_2, %c0_3] : memref<128x128xbf16, #tpu.memory_space<vmem>>, vector<128x128xbf16>
    %cst = arith.constant dense<0.000000e+00> : vector<256x128xf32>
    %5 = tpu.matmul %3, %4, %cst {dimension_numbers = #tpu.dot_dimension_numbers<[1], [0], [0], [1], [0, 0, 1, 1], [], []>} : vector<256x128xbf16>, vector<128x128xbf16>, vector<256x128xf32> -> vector<256x128xf32>
    %6 = arith.index_cast %arg0 : i32 to index
    %c0_4 = arith.constant 0 : index
    %c0_5 = arith.constant 0 : index
    %7 = vector.load %arg6[%6, %c0_4, %c0_5] : memref<2x256x128xf32, #tpu.memory_space<vmem>>, vector<1x256x128xf32>
    %8 = vector.shape_cast %7 : vector<1x256x128xf32> to vector<256x128xf32>
    %9 = vector.shape_cast %5 : vector<256x128xf32> to vector<1x256x128xf32>
    tpu.vector_store %arg6[%6, %c0_4, %c0_5], %9 {strides = array<i32>} : memref<2x256x128xf32, #tpu.memory_space<vmem>>, vector<1x256x128xf32>,
    %10 = vector.shape_cast %5 : vector<256x128xf32> to vector<32x8x128xf32>
    %c0_6 = arith.constant 0 : index
    %c0_7 = arith.constant 0 : index
    %11 = vector.load %arg7[%c0_6, %c0_7] : memref<8x128xf32, #tpu.memory_space<vmem>>, vector<8x128xf32>
    %cst_8 = arith.constant dense<0.000000e+00> : vector<8x128xf32>
    %12 = vector.multi_reduction <add>, %10, %cst_8 [0] : vector<32x8x128xf32> to vector<8x128xf32>
    %13 = arith.addf %11, %12 : vector<8x128xf32>
    %c0_9 = arith.constant 0 : index
    %c0_10 = arith.constant 0 : index
    %14 = vector.load %arg7[%c0_9, %c0_10] : memref<8x128xf32, #tpu.memory_space<vmem>>, vector<8x128xf32>
    tpu.vector_store %arg7[%c0_9, %c0_10], %13 {strides = array<i32>} : memref<8x128xf32, #tpu.memory_space<vmem>>, vector<8x128xf32>,
    %c0_11 = arith.constant 0 : index
    %c0_12 = arith.constant 0 : index
    %15 = vector.load %arg8[%c0_11, %c0_12] : memref<8x128xf32, #tpu.memory_space<vmem>>, vector<8x128xf32>
    %16 = arith.mulf %10, %10 : vector<32x8x128xf32>
    %cst_13 = arith.constant dense<0.000000e+00> : vector<8x128xf32>
    %17 = vector.multi_reduction <add>, %16, %cst_13 [0] : vector<32x8x128xf32> to vector<8x128xf32>
    %18 = arith.addf %15, %17 : vector<8x128xf32>
    %c0_14 = arith.constant 0 : index
    %c0_15 = arith.constant 0 : index
    %19 = vector.load %arg8[%c0_14, %c0_15] : memref<8x128xf32, #tpu.memory_space<vmem>>, vector<8x128xf32>
    tpu.vector_store %arg8[%c0_14, %c0_15], %18 {strides = array<i32>} : memref<8x128xf32, #tpu.memory_space<vmem>>, vector<8x128xf32>,
    %c1_i32 = arith.constant 1 : i32
    %20 = arith.cmpi eq, %arg0, %c1_i32 : i32
    %21 = arith.extui %20 : i1 to i32
    %c0_i32_16 = arith.constant 0 : i32
    %22 = arith.cmpi ne, %21, %c0_i32_16 : i32
    scf.if %22 {
      %c0_17 = arith.constant 0 : index
      %c0_18 = arith.constant 0 : index
      %23 = vector.load %arg7[%c0_17, %c0_18] : memref<8x128xf32, #tpu.memory_space<vmem>>, vector<8x128xf32>
      %cst_19 = arith.constant dense<0.000000e+00> : vector<128xf32>
      %24 = vector.multi_reduction <add>, %23, %cst_19 [0] : vector<8x128xf32> to vector<128xf32>
      %25 = vector.shape_cast %24 : vector<128xf32> to vector<1x128xf32>
      %c0_20 = arith.constant 0 : index
      %c0_21 = arith.constant 0 : index
      %26 = vector.load %arg8[%c0_20, %c0_21] : memref<8x128xf32, #tpu.memory_space<vmem>>, vector<8x128xf32>
      %cst_22 = arith.constant dense<0.000000e+00> : vector<128xf32>
      %27 = vector.multi_reduction <add>, %26, %cst_22 [0] : vector<8x128xf32> to vector<128xf32>
      %28 = vector.shape_cast %27 : vector<128xf32> to vector<1x128xf32>
      %cst_23 = arith.constant 0.001953125 : f32
      %29 = vector.broadcast %cst_23 : f32 to vector<1x128xf32>
      %30 = arith.mulf %25, %29 : vector<1x128xf32>
      %cst_24 = arith.constant 0.001953125 : f32
      %31 = vector.broadcast %cst_24 : f32 to vector<1x128xf32>
      %32 = arith.mulf %28, %31 : vector<1x128xf32>
      %33 = arith.mulf %30, %30 : vector<1x128xf32>
      %34 = arith.subf %32, %33 : vector<1x128xf32>
      %cst_25 = arith.constant 0.000000e+00 : f32
      %35 = vector.broadcast %cst_25 : f32 to vector<1x128xf32>
      %36 = arith.maximumf %34, %35 : vector<1x128xf32>
      %cst_26 = arith.constant 9.99999974E-6 : f32
      %37 = vector.broadcast %cst_26 : f32 to vector<1x128xf32>
      %38 = arith.addf %36, %37 : vector<1x128xf32>
      %39 = math.rsqrt %38 : vector<1x128xf32>
      %c0_27 = arith.constant 0 : index
      %c0_28 = arith.constant 0 : index
      %40 = vector.load %arg3[%c0_27, %c0_28] : memref<1x128xf32, #tpu.memory_space<vmem>>, vector<1x128xf32>
      %41 = arith.mulf %40, %39 : vector<1x128xf32>
      %c0_29 = arith.constant 0 : index
      %c0_30 = arith.constant 0 : index
      %42 = vector.load %arg4[%c0_29, %c0_30] : memref<1x128xf32, #tpu.memory_space<vmem>>, vector<1x128xf32>
      %43 = arith.mulf %30, %41 : vector<1x128xf32>
      %44 = arith.subf %42, %43 : vector<1x128xf32>
      %c0_31 = arith.constant 0 : index
      %c0_32 = arith.constant 0 : index
      %c0_33 = arith.constant 0 : index
      %45 = vector.load %arg6[%c0_31, %c0_32, %c0_33] : memref<2x256x128xf32, #tpu.memory_space<vmem>>, vector<1x256x128xf32>
      %46 = vector.shape_cast %45 : vector<1x256x128xf32> to vector<256x128xf32>
      %47 = vector.broadcast %41 : vector<1x128xf32> to vector<256x128xf32>
      %48 = arith.mulf %46, %47 : vector<256x128xf32>
      %49 = vector.broadcast %44 : vector<1x128xf32> to vector<256x128xf32>
      %50 = arith.addf %48, %49 : vector<256x128xf32>
      %cst_34 = arith.constant 0.000000e+00 : f32
      %51 = vector.broadcast %cst_34 : f32 to vector<256x128xf32>
      %52 = arith.maximumf %50, %51 : vector<256x128xf32>
      %53 = tpu.transpose %52, [1, 0] : vector<256x128xf32> -> vector<128x256xf32>
      %54 = vector.extract_strided_slice %53 {offsets = [0, 0], sizes = [8, 256], strides = [1, 1]} : vector<128x256xf32> to vector<8x256xf32>
      %c0_35 = arith.constant 0 : index
      %c0_36 = arith.constant 0 : index
      %c0_37 = arith.constant 0 : index
      %55 = vector.load %arg5[%c0_35, %c0_36, %c0_37] : memref<2x8x256xf32, #tpu.memory_space<vmem>>, vector<1x8x256xf32>
      %56 = vector.shape_cast %55 : vector<1x8x256xf32> to vector<8x256xf32>
      %57 = vector.shape_cast %54 : vector<8x256xf32> to vector<1x8x256xf32>
      tpu.vector_store %arg5[%c0_35, %c0_36, %c0_37], %57 {strides = array<i32>} : memref<2x8x256xf32, #tpu.memory_space<vmem>>, vector<1x8x256xf32>,
      %c1 = arith.constant 1 : index
      %c0_38 = arith.constant 0 : index
      %c0_39 = arith.constant 0 : index
      %58 = vector.load %arg6[%c1, %c0_38, %c0_39] : memref<2x256x128xf32, #tpu.memory_space<vmem>>, vector<1x256x128xf32>
      %59 = vector.shape_cast %58 : vector<1x256x128xf32> to vector<256x128xf32>
      %60 = vector.broadcast %41 : vector<1x128xf32> to vector<256x128xf32>
      %61 = arith.mulf %59, %60 : vector<256x128xf32>
      %62 = vector.broadcast %44 : vector<1x128xf32> to vector<256x128xf32>
      %63 = arith.addf %61, %62 : vector<256x128xf32>
      %cst_40 = arith.constant 0.000000e+00 : f32
      %64 = vector.broadcast %cst_40 : f32 to vector<256x128xf32>
      %65 = arith.maximumf %63, %64 : vector<256x128xf32>
      %66 = tpu.transpose %65, [1, 0] : vector<256x128xf32> -> vector<128x256xf32>
      %67 = vector.extract_strided_slice %66 {offsets = [0, 0], sizes = [8, 256], strides = [1, 1]} : vector<128x256xf32> to vector<8x256xf32>
      %c1_41 = arith.constant 1 : index
      %c0_42 = arith.constant 0 : index
      %c0_43 = arith.constant 0 : index
      %68 = vector.load %arg5[%c1_41, %c0_42, %c0_43] : memref<2x8x256xf32, #tpu.memory_space<vmem>>, vector<1x8x256xf32>
      %69 = vector.shape_cast %68 : vector<1x8x256xf32> to vector<8x256xf32>
      %70 = vector.shape_cast %67 : vector<8x256xf32> to vector<1x8x256xf32>
      tpu.vector_store %arg5[%c1_41, %c0_42, %c0_43], %70 {strides = array<i32>} : memref<2x8x256xf32, #tpu.memory_space<vmem>>, vector<1x8x256xf32>,
    } else {
    }
    return
  }
  func.func @transform_0(%arg0: i32) -> (i32, i32) {
    %c0_i32 = arith.constant 0 : i32
    %c0_i32_0 = arith.constant 0 : i32
    return %arg0, %c0_i32 : i32, i32
  }
  func.func @transform_1(%arg0: i32) -> (i32, i32) {
    %c0_i32 = arith.constant 0 : i32
    %c0_i32_0 = arith.constant 0 : i32
    %c0_i32_1 = arith.constant 0 : i32
    return %c0_i32, %c0_i32_0 : i32, i32
  }
  func.func @transform_2(%arg0: i32) -> (i32, i32) {
    %c0_i32 = arith.constant 0 : i32
    %c0_i32_0 = arith.constant 0 : i32
    %c0_i32_1 = arith.constant 0 : i32
    return %c0_i32, %c0_i32_0 : i32, i32
  }
  func.func @transform_3(%arg0: i32) -> (i32, i32) {
    %c0_i32 = arith.constant 0 : i32
    %c0_i32_0 = arith.constant 0 : i32
    %c0_i32_1 = arith.constant 0 : i32
    return %c0_i32, %c0_i32_0 : i32, i32
  }
  func.func @transform_4(%arg0: i32) -> (i32, i32, i32) {
    %c0_i32 = arith.constant 0 : i32
    %c0_i32_0 = arith.constant 0 : i32
    %c0_i32_1 = arith.constant 0 : i32
    %c0_i32_2 = arith.constant 0 : i32
    return %c0_i32, %c0_i32_0, %c0_i32_1 : i32, i32, i32
  }
}

module attributes {stable_mosaic.version = 11 : i64} {
  func.func @_fused_conv_bn_relu_kernel(%arg0: i32, %arg1: memref<256x128xbf16, #tpu.memory_space<vmem>>, %arg2: memref<128x128xbf16, #tpu.memory_space<vmem>>, %arg3: memref<1x128xf32, #tpu.memory_space<vmem>>, %arg4: memref<1x128xf32, #tpu.memory_space<vmem>>, %arg5: memref<2x8x256xf32, #tpu.memory_space<vmem>>, %arg6: memref<2x256x128xf32, #tpu.memory_space<vmem>>, %arg7: memref<8x128xf32, #tpu.memory_space<vmem>>, %arg8: memref<8x128xf32, #tpu.memory_space<vmem>>) attributes {dimension_semantics = [#tpu.dimension_semantics<arbitrary>], iteration_bounds = array<i64: 2>, scalar_prefetch = 0 : i64, scratch_operands = 3 : i64, tpu.core_type = #tpu.core_type<tc>, window_params = [{transform_indices = @transform_0, window_bounds = array<i64: 256, 128>}, {pipeline_mode = #tpu.pipeline_mode<synchronous>, transform_indices = @transform_1, window_bounds = array<i64: 128, 128>}, {pipeline_mode = #tpu.pipeline_mode<synchronous>, transform_indices = @transform_2, window_bounds = array<i64: 1, 128>}, {pipeline_mode = #tpu.pipeline_mode<synchronous>, transform_indices = @transform_3, window_bounds = array<i64: 1, 128>}, {pipeline_mode = #tpu.pipeline_mode<synchronous>, transform_indices = @transform_4, window_bounds = array<i64: 2, 8, 256>}]} {
    %c0_i32 = arith.constant 0 : i32
    %0 = arith.cmpi eq, %arg0, %c0_i32 : i32
    %1 = arith.extui %0 : i1 to i32
    %c0_i32_0 = arith.constant 0 : i32
    %2 = arith.cmpi ne, %1, %c0_i32_0 : i32
    scf.if %2 {
      %cst_17 = arith.constant 0.000000e+00 : f32
      %23 = vector.broadcast %cst_17 : f32 to vector<8x128xf32>
      %c0_18 = arith.constant 0 : index
      %c0_19 = arith.constant 0 : index
      %24 = vector.load %arg7[%c0_18, %c0_19] : memref<8x128xf32, #tpu.memory_space<vmem>>, vector<8x128xf32>
      tpu.vector_store %arg7[%c0_18, %c0_19], %23 {strides = array<i32>} : memref<8x128xf32, #tpu.memory_space<vmem>>, vector<8x128xf32>,
      %cst_20 = arith.constant 0.000000e+00 : f32
      %25 = vector.broadcast %cst_20 : f32 to vector<8x128xf32>
      %c0_21 = arith.constant 0 : index
      %c0_22 = arith.constant 0 : index
      %26 = vector.load %arg8[%c0_21, %c0_22] : memref<8x128xf32, #tpu.memory_space<vmem>>, vector<8x128xf32>
      tpu.vector_store %arg8[%c0_21, %c0_22], %25 {strides = array<i32>} : memref<8x128xf32, #tpu.memory_space<vmem>>, vector<8x128xf32>,
    } else {
    }
    %c0 = arith.constant 0 : index
    %c0_1 = arith.constant 0 : index
    %3 = vector.load %arg1[%c0, %c0_1] : memref<256x128xbf16, #tpu.memory_space<vmem>>, vector<256x128xbf16>
    %c0_2 = arith.constant 0 : index
    %c0_3 = arith.constant 0 : index
    %4 = vector.load %arg2[%c0_2, %c0_3] : memref<128x128xbf16, #tpu.memory_space<vmem>>, vector<128x128xbf16>
    %cst = arith.constant dense<0.000000e+00> : vector<256x128xf32>
    %5 = tpu.matmul %3, %4, %cst {dimension_numbers = #tpu.dot_dimension_numbers<[1], [0], [0], [1], [0, 0, 1, 1], [], []>} : vector<256x128xbf16>, vector<128x128xbf16>, vector<256x128xf32> -> vector<256x128xf32>
    %6 = arith.index_cast %arg0 : i32 to index
    %c0_4 = arith.constant 0 : index
    %c0_5 = arith.constant 0 : index
    %7 = vector.load %arg6[%6, %c0_4, %c0_5] : memref<2x256x128xf32, #tpu.memory_space<vmem>>, vector<1x256x128xf32>
    %8 = vector.shape_cast %7 : vector<1x256x128xf32> to vector<256x128xf32>
    %9 = vector.shape_cast %5 : vector<256x128xf32> to vector<1x256x128xf32>
    tpu.vector_store %arg6[%6, %c0_4, %c0_5], %9 {strides = array<i32>} : memref<2x256x128xf32, #tpu.memory_space<vmem>>, vector<1x256x128xf32>,
    %10 = vector.shape_cast %5 : vector<256x128xf32> to vector<32x8x128xf32>
    %c0_6 = arith.constant 0 : index
    %c0_7 = arith.constant 0 : index
    %11 = vector.load %arg7[%c0_6, %c0_7] : memref<8x128xf32, #tpu.memory_space<vmem>>, vector<8x128xf32>
    %cst_8 = arith.constant dense<0.000000e+00> : vector<8x128xf32>
    %12 = vector.multi_reduction <add>, %10, %cst_8 [0] : vector<32x8x128xf32> to vector<8x128xf32>
    %13 = arith.addf %11, %12 : vector<8x128xf32>
    %c0_9 = arith.constant 0 : index
    %c0_10 = arith.constant 0 : index
    %14 = vector.load %arg7[%c0_9, %c0_10] : memref<8x128xf32, #tpu.memory_space<vmem>>, vector<8x128xf32>
    tpu.vector_store %arg7[%c0_9, %c0_10], %13 {strides = array<i32>} : memref<8x128xf32, #tpu.memory_space<vmem>>, vector<8x128xf32>,
    %c0_11 = arith.constant 0 : index
    %c0_12 = arith.constant 0 : index
    %15 = vector.load %arg8[%c0_11, %c0_12] : memref<8x128xf32, #tpu.memory_space<vmem>>, vector<8x128xf32>
    %16 = arith.mulf %10, %10 : vector<32x8x128xf32>
    %cst_13 = arith.constant dense<0.000000e+00> : vector<8x128xf32>
    %17 = vector.multi_reduction <add>, %16, %cst_13 [0] : vector<32x8x128xf32> to vector<8x128xf32>
    %18 = arith.addf %15, %17 : vector<8x128xf32>
    %c0_14 = arith.constant 0 : index
    %c0_15 = arith.constant 0 : index
    %19 = vector.load %arg8[%c0_14, %c0_15] : memref<8x128xf32, #tpu.memory_space<vmem>>, vector<8x128xf32>
    tpu.vector_store %arg8[%c0_14, %c0_15], %18 {strides = array<i32>} : memref<8x128xf32, #tpu.memory_space<vmem>>, vector<8x128xf32>,
    %c1_i32 = arith.constant 1 : i32
    %20 = arith.cmpi eq, %arg0, %c1_i32 : i32
    %21 = arith.extui %20 : i1 to i32
    %c0_i32_16 = arith.constant 0 : i32
    %22 = arith.cmpi ne, %21, %c0_i32_16 : i32
    scf.if %22 {
      %c0_17 = arith.constant 0 : index
      %c0_18 = arith.constant 0 : index
      %23 = vector.load %arg7[%c0_17, %c0_18] : memref<8x128xf32, #tpu.memory_space<vmem>>, vector<8x128xf32>
      %cst_19 = arith.constant dense<0.000000e+00> : vector<128xf32>
      %24 = vector.multi_reduction <add>, %23, %cst_19 [0] : vector<8x128xf32> to vector<128xf32>
      %25 = vector.shape_cast %24 : vector<128xf32> to vector<1x128xf32>
      %c0_20 = arith.constant 0 : index
      %c0_21 = arith.constant 0 : index
      %26 = vector.load %arg8[%c0_20, %c0_21] : memref<8x128xf32, #tpu.memory_space<vmem>>, vector<8x128xf32>
      %cst_22 = arith.constant dense<0.000000e+00> : vector<128xf32>
      %27 = vector.multi_reduction <add>, %26, %cst_22 [0] : vector<8x128xf32> to vector<128xf32>
      %28 = vector.shape_cast %27 : vector<128xf32> to vector<1x128xf32>
      %cst_23 = arith.constant 0.001953125 : f32
      %29 = vector.broadcast %cst_23 : f32 to vector<1x128xf32>
      %30 = arith.mulf %25, %29 : vector<1x128xf32>
      %cst_24 = arith.constant 0.001953125 : f32
      %31 = vector.broadcast %cst_24 : f32 to vector<1x128xf32>
      %32 = arith.mulf %28, %31 : vector<1x128xf32>
      %33 = arith.mulf %30, %30 : vector<1x128xf32>
      %34 = arith.subf %32, %33 : vector<1x128xf32>
      %cst_25 = arith.constant 0.000000e+00 : f32
      %35 = vector.broadcast %cst_25 : f32 to vector<1x128xf32>
      %36 = arith.maximumf %34, %35 : vector<1x128xf32>
      %cst_26 = arith.constant 9.99999974E-6 : f32
      %37 = vector.broadcast %cst_26 : f32 to vector<1x128xf32>
      %38 = arith.addf %36, %37 : vector<1x128xf32>
      %39 = math.rsqrt %38 : vector<1x128xf32>
      %c0_27 = arith.constant 0 : index
      %c0_28 = arith.constant 0 : index
      %40 = vector.load %arg3[%c0_27, %c0_28] : memref<1x128xf32, #tpu.memory_space<vmem>>, vector<1x128xf32>
      %41 = arith.mulf %40, %39 : vector<1x128xf32>
      %c0_29 = arith.constant 0 : index
      %c0_30 = arith.constant 0 : index
      %42 = vector.load %arg4[%c0_29, %c0_30] : memref<1x128xf32, #tpu.memory_space<vmem>>, vector<1x128xf32>
      %43 = arith.mulf %30, %41 : vector<1x128xf32>
      %44 = arith.subf %42, %43 : vector<1x128xf32>
      %c0_31 = arith.constant 0 : index
      %c0_32 = arith.constant 0 : index
      %c0_33 = arith.constant 0 : index
      %45 = vector.load %arg6[%c0_31, %c0_32, %c0_33] : memref<2x256x128xf32, #tpu.memory_space<vmem>>, vector<1x256x128xf32>
      %46 = vector.shape_cast %45 : vector<1x256x128xf32> to vector<256x128xf32>
      %47 = vector.broadcast %41 : vector<1x128xf32> to vector<256x128xf32>
      %48 = arith.mulf %46, %47 : vector<256x128xf32>
      %49 = vector.broadcast %44 : vector<1x128xf32> to vector<256x128xf32>
      %50 = arith.addf %48, %49 : vector<256x128xf32>
      %cst_34 = arith.constant 0.000000e+00 : f32
      %51 = vector.broadcast %cst_34 : f32 to vector<256x128xf32>
      %52 = arith.maximumf %50, %51 : vector<256x128xf32>
      %53 = tpu.transpose %52, [1, 0] : vector<256x128xf32> -> vector<128x256xf32>
      %54 = vector.extract_strided_slice %53 {offsets = [0, 0], sizes = [8, 256], strides = [1, 1]} : vector<128x256xf32> to vector<8x256xf32>
      %c0_35 = arith.constant 0 : index
      %c0_36 = arith.constant 0 : index
      %c0_37 = arith.constant 0 : index
      %55 = vector.load %arg5[%c0_35, %c0_36, %c0_37] : memref<2x8x256xf32, #tpu.memory_space<vmem>>, vector<1x8x256xf32>
      %56 = vector.shape_cast %55 : vector<1x8x256xf32> to vector<8x256xf32>
      %57 = vector.shape_cast %54 : vector<8x256xf32> to vector<1x8x256xf32>
      tpu.vector_store %arg5[%c0_35, %c0_36, %c0_37], %57 {strides = array<i32>} : memref<2x8x256xf32, #tpu.memory_space<vmem>>, vector<1x8x256xf32>,
      %c1 = arith.constant 1 : index
      %c0_38 = arith.constant 0 : index
      %c0_39 = arith.constant 0 : index
      %58 = vector.load %arg6[%c1, %c0_38, %c0_39] : memref<2x256x128xf32, #tpu.memory_space<vmem>>, vector<1x256x128xf32>
      %59 = vector.shape_cast %58 : vector<1x256x128xf32> to vector<256x128xf32>
      %60 = vector.broadcast %41 : vector<1x128xf32> to vector<256x128xf32>
      %61 = arith.mulf %59, %60 : vector<256x128xf32>
      %62 = vector.broadcast %44 : vector<1x128xf32> to vector<256x128xf32>
      %63 = arith.addf %61, %62 : vector<256x128xf32>
      %cst_40 = arith.constant 0.000000e+00 : f32
      %64 = vector.broadcast %cst_40 : f32 to vector<256x128xf32>
      %65 = arith.maximumf %63, %64 : vector<256x128xf32>
      %66 = tpu.transpose %65, [1, 0] : vector<256x128xf32> -> vector<128x256xf32>
      %67 = vector.extract_strided_slice %66 {offsets = [0, 0], sizes = [8, 256], strides = [1, 1]} : vector<128x256xf32> to vector<8x256xf32>
      %c1_41 = arith.constant 1 : index
      %c0_42 = arith.constant 0 : index
      %c0_43 = arith.constant 0 : index
      %68 = vector.load %arg5[%c1_41, %c0_42, %c0_43] : memref<2x8x256xf32, #tpu.memory_space<vmem>>, vector<1x8x256xf32>
      %69 = vector.shape_cast %68 : vector<1x8x256xf32> to vector<8x256xf32>
      %70 = vector.shape_cast %67 : vector<8x256xf32> to vector<1x8x256xf32>
      tpu.vector_store %arg5[%c1_41, %c0_42, %c0_43], %70 {strides = array<i32>} : memref<2x8x256xf32, #tpu.memory_space<vmem>>, vector<1x8x256xf32>,
    } else {
    }
    return
  }
  func.func @transform_0(%arg0: i32) -> (i32, i32) {
    %c0_i32 = arith.constant 0 : i32
    %c0_i32_0 = arith.constant 0 : i32
    return %arg0, %c0_i32 : i32, i32
  }
  func.func @transform_1(%arg0: i32) -> (i32, i32) {
    %c0_i32 = arith.constant 0 : i32
    %c0_i32_0 = arith.constant 0 : i32
    %c0_i32_1 = arith.constant 0 : i32
    return %c0_i32, %c0_i32_0 : i32, i32
  }
  func.func @transform_2(%arg0: i32) -> (i32, i32) {
    %c0_i32 = arith.constant 0 : i32
    %c0_i32_0 = arith.constant 0 : i32
    %c0_i32_1 = arith.constant 0 : i32
    return %c0_i32, %c0_i32_0 : i32, i32
  }
  func.func @transform_3(%arg0: i32) -> (i32, i32) {
    %c0_i32 = arith.constant 0 : i32
    %c0_i32_0 = arith.constant 0 : i32
    %c0_i32_1 = arith.constant 0 : i32
    return %c0_i32, %c0_i32_0 : i32, i32
  }
  func.func @transform_4(%arg0: i32) -> (i32, i32, i32) {
    %c0_i32 = arith.constant 0 : i32
    %c0_i32_0 = arith.constant 0 : i32
    %c0_i32_1 = arith.constant 0 : i32
    %c0_i32_2 = arith.constant 0 : i32
    return %c0_i32, %c0_i32_0, %c0_i32_1 : i32, i32, i32
  }
}

</mosaic_0001>

<bundles_post_ra>
// kernel: tpu_custom_call.1
= control target key start
LH: loop header
LB: loop body
LE: loop exit
PB: predicated region body
PF: predicated region fallthrough
CT: control target
= control target key end

     0   :  { %9 = vsyncpa [#allocation6], 0  ;;  %s1960_s0 = inlined_call_operand.hbm [shape: bf16[512,128], index: 0, kind: input, shape index: {}]   ;;  %s1961_s1 = inlined_call_operand.hbm [shape: bf16[128,128], index: 1, kind: input, shape index: {}]   ;;  %s1962_s2 = inlined_call_operand.vmem [shape: f32[1,128], index: 2, kind: input, shape index: {}]   ;;  %s1963_s3 = inlined_call_operand.vmem [shape: f32[1,128], index: 3, kind: input, shape index: {}]   ;;  %s1964_s4 = inlined_call_operand.hbm [shape: f32[2,8,256], index: 4, kind: output, shape index: {}]  }
   0x1   :  { %11 = vsyncpa [#allocation6 + $0x1], 0 }
   0x2   :  { %12 = vsyncpa [#allocation9], 0 }
   0x3   :  { %13 = vsyncpa [#allocation7], 0  ;;  %s1543_s15 = smov 0   ;;  %s1545_s16 = smov 0  }
   0x4   :  { %s1547_s17 = smov 0   ;;  %s1549_s18 = smov 0  }
   0x5 LB: > { %s1562_s19 = sadd.s32 4294967295, %s1509_s18   ;;  %p39_p0 = scmp.ne.s32.totalorder %s1501_s16, %s1497_s15  ;;  %s1509_s18 = sphi %s1549_s18, %s1971_s18   ;;  %s1505_s17 = sphi %s1547_s17, %s1970_s17   ;;  %s1501_s16 = sphi %s1545_s16, %s1969_s16   ;;  %s1497_s15 = sphi %s1543_s15, %s1968_s15  }
   0x6   : > { %p40_p1 = scmp.eq.s32.totalorder %s1562_s19, 0  ;;  %p1154_p2 = scmp.ge.s32.totalorder %s1509_s18, 1 }
   0x7   : > { %p134_p3 = scmp.lt.s32.totalorder %s1509_s18, 3  ;;  %p1155_p4 = scmp.ne.s32.totalorder %s1562_s19, 0 }
   0x8   : > { %p1571_p5 = por %p40_p1, %p39_p0  ;;  %s145_s23 = sshll.u32 %s1961_s1, 4  ;;  %s146_s23 = int_to_ptr.hbm [resolvable:$true] %s145_s23 }
   0x9   : > { %p1578_p6 = pnand %p1154_p2, %p134_p3  ;;  %s1511_s25 = smov [#allocation8]  }
   0xa   : > { %s147_s26 = sshll.u32 %s1511_s25, 4  ;;  %s1587_s27 = sadd.s32 1, %s1509_s18   ;;  %s148_s26 = int_to_ptr.vmem [resolvable:$true] %s147_s26 }
   0xb   : > { %p1325_p7 = pneg %p1578_p6  ;;  %s1512_s28 = smov 64  }
   0xc   : > { %s1513_s29 = smov 4   ;;  %s23_s30 = ssub.s32 %s1509_s18, %s1587_s27 }
   0xd   : > { %p1326_p8 = pnand %p1325_p7, %p40_p1  ;;  %s26_s5 = sadd.s32 1, %s1505_s17 }
   0xe   : > { %p24_p9 = scmp.eq.s32.totalorder %s23_s30, 0  ;;  %p33_p10 = scmp.ne.s32.totalorder %s1505_s17, %s1501_s16 }
   0xf   : > { %1328 = dma.hbm_to_vmem [thread:$0]  (!%p1326_p8), %s146_s23, 1024, %s148_s26, [#allocation9], %s1512_s28, %s1512_s28, %s1513_s29  }
  0x10   : > { %p34_p11 = scmp.eq.s32.totalorder %s1509_s18, 0  ;;  %p1334_p12 = scmp.lt.s32.totalorder %s1509_s18, 2 }
  0x11   : > { %s1600_s6 = scalar_select %p24_p9, %s1505_s17, %s26_s5  }
  0x12   : > { %p35_p13 = por %p34_p11, %p33_p10  ;;  %s167_s7 = sand.u32 1, %s1505_s17  }
  0x13   : > { %s1157_s8 = sshll.u32 %s167_s7, 7  ;;  %s1266_s9 = sshll.u32 %s1509_s18, 7 }
  0x14   : > { %s176_s12 = scalar_lea.hbm %s1960_s0, %s1266_s9  ;;  %s171_s13 = scalar_lea.vmem [#allocation5], %s1157_s8 }
  0x15   : > { %s179_s14 = sshll.u32 %s171_s13, 4  ;;  %s177_s15 = sshll.u32 %s176_s12, 4  ;;  %s180_s14 = int_to_ptr.vmem [resolvable:$true] %s179_s14  ;;  %s178_s15 = int_to_ptr.hbm [resolvable:$true] %s177_s15 }
  0x16   : > { %p1607_p0 = pnand %p1334_p12, %p35_p13  ;;  %s168_s22 = scalar_lea.sflag [#allocation6], %s167_s7 }
  0x17   : > { %s1409_s23 = sshra.s32 %s178_s15, 4  ;;  %s1416_s30 = scalar_lea.hbm %s1960_s0, 256  ;;  %s1410_s23 = int_to_ptr.hbm [resolvable:$true] %s1409_s23 }
  0x18   : > { %s1411_s25 = scalar_lea.hbm %s1410_s23, 128  ;;  %p1413_p3 = pneg %p1607_p0 }
  0x19   : > { %p1412_p2 = scmp.ne.s32.totalorder %s1410_s23, %s1411_s25  ;;  %p1417_p9 = scmp.lt.s32.totalorder %s1410_s23, %s1960_s0 }
  0x1a   : > { %p1418_p10 = scmp.lt.s32.totalorder %s1416_s30, %s1411_s25 }
  0x1b   : > { %p1414_p7 = pnand %p1413_p3, %p1412_p2 }
  0x1c   : > { %p1419_p11 = por %p1418_p10, %p1417_p9 }
  0x1d   : > { %p1415_p8 = pneg %p1414_p7 }
  0x1f   : > { %p1420_p12 = pnand %p1419_p11, %p1415_p8 }
  0x21   : > { %1423 = shalt.err (!%p1420_p12)
}
  0x22   : > { %1332 = dma.hbm_to_vmem [thread:$0]  (!%p1607_p0), %s178_s15, 2048, %s180_s14, %s168_s22, %s1512_s28, %s1512_s28, %s1513_s29  }
  0x23   : > { %191 = sbr.rel (%p1578_p6) target bundleno = 677 (0x2a5), region = 36  ;;  %s193_s7 = sand.u32 (!%p1578_p6), 1, %s1501_s16  }
  0x24   : > { %s1161_s9 = sshll.u32 (!%p1578_p6), %s193_s7, 7  ;;  %s194_s10 = scalar_lea.sflag (!%p1578_p6), [#allocation6], %s193_s7 }
  0x25   : > { %s1627_s11 = scalar_lea.vmem (!%p1578_p6), [#allocation5], %s1161_s9 }
  0x28   : > { %1484 = dma.done.wait (%p1571_p5), %s194_s10, 2048  }
  0x29   : > { %1486 = vsyncadd (%p1571_p5), %s194_s10, 4294965248 }
  0x2a   : > { %1488 = dma.done.wait (%p40_p1), [#allocation9], 1024  }
  0x2b   : > { %1490 = vsyncadd (%p40_p1), [#allocation9], 4294966272  ;;  %227 = sbr.rel (%p1155_p4) target bundleno = 51 (0x33), region = 48 }
  0x30   : > { %v1514_v0 = vmov 0.0  }
  0x31   : > { %228 = vst [vmem:[#allocation3] sm:$0xff] %v1514_v0 }
  0x32   : > { %229 = vst [vmem:[#allocation4] sm:$0xff] %v1514_v0 }
  0x33 PF: > { %v1290_v1 = vld [vmem:[#allocation8 + $0x38] sm:$0xff]  ;;  %v1289_v2 = vld [vmem:[#allocation8 + $0x30] sm:$0xff]  ;;  %v1288_v3 = vld [vmem:[#allocation8 + $0x28] sm:$0xff]  ;;  %s1260_s20 = sshll.u32 %s1562_s19, 8  ;;  %p1261_p1 = scmp.ne.s32.totalorder %s1562_s19, 1 }
  0x34   : > { %422 = vmatpush.bf16.msra.mxu0 %v1290_v1  ;;  %1291 = vmatpush.bf16.msra.mxu1 %v1290_v1  ;;  %v1287_v4 = vld [vmem:[#allocation8 + $0x20] sm:$0xff]  ;;  %v1286_v5 = vld [vmem:[#allocation8 + $0x18] sm:$0xff]  ;;  %v1285_v6 = vld [vmem:[#allocation8 + $0x10] sm:$0xff]  ;;  %s1658_s24 = scalar_lea.vmem [#allocation2], %s1260_s20 }
  0x35   : > { %1292 = vmatpush.bf16.msra.mxu2 %v1290_v1  ;;  %1293 = vmatpush.bf16.msra.mxu3 %v1290_v1  ;;  %v1284_v7 = vld [vmem:[#allocation8 + $0x8] sm:$0xff]  ;;  %v1283_v8 = vld [vmem:[#allocation8] sm:$0xff]  ;;  %v1269_v17 = vld [vmem:[%s1627_s11 + $0x10] sm:$0xff] }
  0x36   : > { %v1267_v9 = vld [vmem:[%s1627_s11] sm:$0xff]  ;;  %v1268_v13 = vld [vmem:[%s1627_s11 + $0x8] sm:$0xff]  ;;  %v1273_v18 = vld [vmem:[%s1627_s11 + $0x30] sm:$0xff] }
  0x37   : > { %v1271_v10 = vld [vmem:[%s1627_s11 + $0x20] sm:$0xff]  ;;  %v1272_v14 = vld [vmem:[%s1627_s11 + $0x28] sm:$0xff]  ;;  %v1277_v19 = vld [vmem:[%s1627_s11 + $0x50] sm:$0xff] }
  0x38   : > { %423 = vmatpush.bf16.msra.mxu0 %v1289_v2  ;;  %1294 = vmatpush.bf16.msra.mxu1 %v1289_v2  ;;  %v1275_v11 = vld [vmem:[%s1627_s11 + $0x40] sm:$0xff]  ;;  %v1276_v15 = vld [vmem:[%s1627_s11 + $0x48] sm:$0xff]  ;;  %v1281_v20 = vld [vmem:[%s1627_s11 + $0x70] sm:$0xff] }
  0x39   : > { %1295 = vmatpush.bf16.msra.mxu2 %v1289_v2  ;;  %1296 = vmatpush.bf16.msra.mxu3 %v1289_v2  ;;  %v1279_v12 = vld [vmem:[%s1627_s11 + $0x60] sm:$0xff]  ;;  %v1280_v16 = vld [vmem:[%s1627_s11 + $0x68] sm:$0xff]  ;;  %v1270_v21 = vld [vmem:[%s1627_s11 + $0x18] sm:$0xff] }
  0x3a   : > { %v1274_v22 = vld [vmem:[%s1627_s11 + $0x38] sm:$0xff] }
  0x3b   : > { %v1278_v23 = vld [vmem:[%s1627_s11 + $0x58] sm:$0xff] }
  0x3c   : > { %424 = vmatpush.bf16.msra.mxu0 %v1288_v3  ;;  %1297 = vmatpush.bf16.msra.mxu1 %v1288_v3  ;;  %v1282_v24 = vld [vmem:[%s1627_s11 + $0x78] sm:$0xff] }
  0x3d   : > { %1298 = vmatpush.bf16.msra.mxu2 %v1288_v3  ;;  %1299 = vmatpush.bf16.msra.mxu3 %v1288_v3 }
  0x40   : > { %425 = vmatpush.bf16.msra.mxu0 %v1287_v4  ;;  %1300 = vmatpush.bf16.msra.mxu1 %v1287_v4 }
  0x41   : > { %1301 = vmatpush.bf16.msra.mxu2 %v1287_v4  ;;  %1302 = vmatpush.bf16.msra.mxu3 %v1287_v4 }
  0x44   : > { %426 = vmatpush.bf16.msra.mxu0 %v1286_v5  ;;  %1303 = vmatpush.bf16.msra.mxu1 %v1286_v5 }
  0x45   : > { %1304 = vmatpush.bf16.msra.mxu2 %v1286_v5  ;;  %1305 = vmatpush.bf16.msra.mxu3 %v1286_v5 }
  0x48   : > { %427 = vmatpush.bf16.msra.mxu0 %v1285_v6  ;;  %1306 = vmatpush.bf16.msra.mxu1 %v1285_v6 }
  0x49   : > { %1307 = vmatpush.bf16.msra.mxu2 %v1285_v6  ;;  %1308 = vmatpush.bf16.msra.mxu3 %v1285_v6 }
  0x4c   : > { %428 = vmatpush.bf16.msra.mxu0 %v1284_v7  ;;  %1309 = vmatpush.bf16.msra.mxu1 %v1284_v7 }
  0x4d   : > { %1310 = vmatpush.bf16.msra.mxu2 %v1284_v7  ;;  %1311 = vmatpush.bf16.msra.mxu3 %v1284_v7 }
  0x50   : > { %429 = vmatpush.bf16.msra.mxu0 %v1283_v8  ;;  %1312 = vmatpush.bf16.msra.mxu1 %v1283_v8 }
  0x51   : > { %1313 = vmatpush.bf16.msra.mxu2 %v1283_v8  ;;  %1314 = vmatpush.bf16.msra.mxu3 %v1283_v8 }
  0x53   : > { %430 = vmatmul.bf16.vlgmr.msra.gmra.mxu0 %v1267_v9  ;;  %450 = vmatmul.bf16.vlgmr.msra.gmra.mxu1 %v1271_v10 }
  0x54   : > { %470 = vmatmul.bf16.vlgmr.msra.gmra.mxu2 %v1275_v11  ;;  %490 = vmatmul.bf16.vlgmr.msra.gmra.mxu3 %v1279_v12 }
  0x63   : > { %435 = vmatmul.bf16.gmra.mxu0 %v1268_v13  ;;  %455 = vmatmul.bf16.gmra.mxu1 %v1272_v14 }
  0x64   : > { %475 = vmatmul.bf16.gmra.mxu2 %v1276_v15  ;;  %495 = vmatmul.bf16.gmra.mxu3 %v1280_v16 }
  0x73   : > { %440 = vmatmul.bf16.gmra.mxu0 %v1269_v17  ;;  %460 = vmatmul.bf16.gmra.mxu1 %v1273_v18 }
  0x74   : > { %480 = vmatmul.bf16.gmra.mxu2 %v1277_v19  ;;  %500 = vmatmul.bf16.gmra.mxu3 %v1281_v20 }
  0x83   : > { %445 = vmatmul.bf16.gmra.mxu0 %v1270_v21  ;;  %465 = vmatmul.bf16.gmra.mxu1 %v1274_v22 }
  0x84   : > { %485 = vmatmul.bf16.gmra.mxu2 %v1278_v23  ;;  %505 = vmatmul.bf16.gmra.mxu3 %v1282_v24 }
  0xd0   : > { %v431_v25 = vpop.f32.mrf.mxu0  ;;  %v1656_v26 = vpop.f32.mrf.mxu1 }
  0xd1   : > { %513 = vst [vmem:[%s1658_s24] sm:$0xff] %v431_v25  ;;  %v580_v48 = vmul.f32 %v431_v25, %v431_v25  ;;  %v588_v12 = vmul.f32 %v1656_v26, %v1656_v26 }
  0xd2   : > { %521 = vst [vmem:[%s1658_s24 + $0x40] sm:$0xff] %v1656_v26 }
  0xd7   : > { %v1663_v27 = vpop.f32.mrf.mxu2  ;;  %v1670_v30 = vpop.f32.mrf.mxu3 }
  0xd8   : > { %v433_v28 = vpop.f32.mrf.mxu0  ;;  %v1665_v29 = vpop.f32.mrf.mxu1  ;;  %529 = vst [vmem:[%s1658_s24 + $0x80] sm:$0xff] %v1663_v27 }
  0xd9   : > { %514 = vst [vmem:[%s1658_s24 + $0x8] sm:$0xff] %v433_v28  ;;  %v581_v47 = vmul.f32 %v433_v28, %v433_v28  ;;  %v546_v49 = vadd.f32 %v433_v28, %v431_v25  ;;  %v589_v15 = vmul.f32 %v1665_v29, %v1665_v29 }
  0xda   : > { %522 = vst [vmem:[%s1658_s24 + $0x48] sm:$0xff] %v1665_v29 }
  0xdb   : > { %537 = vst [vmem:[%s1658_s24 + $0xc0] sm:$0xff] %v1670_v30  ;;  %v612_v51 = vadd.f32 %v581_v47, %v580_v48 }
  0xdf   : > { %v1676_v31 = vpop.f32.mrf.mxu2  ;;  %v1683_v34 = vpop.f32.mrf.mxu3 }
  0xe0   : > { %v436_v32 = vpop.f32.mrf.mxu0  ;;  %v1678_v33 = vpop.f32.mrf.mxu1  ;;  %530 = vst [vmem:[%s1658_s24 + $0x88] sm:$0xff] %v1676_v31 }
  0xe1   : > { %515 = vst [vmem:[%s1658_s24 + $0x10] sm:$0xff] %v436_v32  ;;  %v582_v50 = vmul.f32 %v436_v32, %v436_v32  ;;  %v547_v52 = vadd.f32 %v546_v49, %v436_v32  ;;  %v590_v18 = vmul.f32 %v1678_v33, %v1678_v33 }
  0xe2   : > { %523 = vst [vmem:[%s1658_s24 + $0x50] sm:$0xff] %v1678_v33 }
  0xe3   : > { %538 = vst [vmem:[%s1658_s24 + $0xc8] sm:$0xff] %v1683_v34  ;;  %v613_v57 = vadd.f32 %v612_v51, %v582_v50  ;;  %v596_v50 = vmul.f32 %v1663_v27, %v1663_v27 }
  0xe7   : > { %v1689_v35 = vpop.f32.mrf.mxu2  ;;  %v1696_v38 = vpop.f32.mrf.mxu3 }
  0xe8   : > { %v438_v36 = vpop.f32.mrf.mxu0  ;;  %v1691_v37 = vpop.f32.mrf.mxu1  ;;  %531 = vst [vmem:[%s1658_s24 + $0x90] sm:$0xff] %v1689_v35 }
  0xe9   : > { %516 = vst [vmem:[%s1658_s24 + $0x18] sm:$0xff] %v438_v36  ;;  %v583_v53 = vmul.f32 %v438_v36, %v438_v36  ;;  %v548_v58 = vadd.f32 %v547_v52, %v438_v36  ;;  %v591_v22 = vmul.f32 %v1691_v37, %v1691_v37 }
  0xea   : > { %524 = vst [vmem:[%s1658_s24 + $0x58] sm:$0xff] %v1691_v37 }
  0xeb   : > { %539 = vst [vmem:[%s1658_s24 + $0xd0] sm:$0xff] %v1696_v38  ;;  %v614_v61 = vadd.f32 %v613_v57, %v583_v53 }
  0xef   : > { %v1702_v39 = vpop.f32.mrf.mxu2  ;;  %v1709_v42 = vpop.f32.mrf.mxu3 }
  0xf0   : > { %v441_v40 = vpop.f32.mrf.mxu0  ;;  %v1704_v41 = vpop.f32.mrf.mxu1  ;;  %532 = vst [vmem:[%s1658_s24 + $0x98] sm:$0xff] %v1702_v39 }
  0xf1   : > { %517 = vst [vmem:[%s1658_s24 + $0x20] sm:$0xff] %v441_v40  ;;  %v584_v59 = vmul.f32 %v441_v40, %v441_v40  ;;  %v549_v62 = vadd.f32 %v548_v58, %v441_v40  ;;  %v599_v58 = vmul.f32 %v1702_v39, %v1702_v39 }
  0xf2   : > { %525 = vst [vmem:[%s1658_s24 + $0x60] sm:$0xff] %v1704_v41 }
  0xf3   : > { %540 = vst [vmem:[%s1658_s24 + $0xd8] sm:$0xff] %v1709_v42  ;;  %v615_v0 = vadd.f32 %v614_v61, %v584_v59 }
  0xf7   : > { %v1715_v43 = vpop.f32.mrf.mxu2  ;;  %v1722_v46 = vpop.f32.mrf.mxu3 }
  0xf8   : > { %v443_v44 = vpop.f32.mrf.mxu0  ;;  %v1717_v45 = vpop.f32.mrf.mxu1  ;;  %533 = vst [vmem:[%s1658_s24 + $0xa0] sm:$0xff] %v1715_v43 }
  0xf9   : > { %518 = vst [vmem:[%s1658_s24 + $0x28] sm:$0xff] %v443_v44  ;;  %v585_v63 = vmul.f32 %v443_v44, %v443_v44  ;;  %v550_v1 = vadd.f32 %v549_v62, %v443_v44  ;;  %v593_v32 = vmul.f32 %v1717_v45, %v1717_v45 }
  0xfa   : > { %526 = vst [vmem:[%s1658_s24 + $0x68] sm:$0xff] %v1717_v45 }
  0xfb   : > { %541 = vst [vmem:[%s1658_s24 + $0xe0] sm:$0xff] %v1722_v46  ;;  %v616_v3 = vadd.f32 %v615_v0, %v585_v63 }
  0xff   : > { %v1728_v54 = vpop.f32.mrf.mxu2  ;;  %v1733_v60 = vpop.f32.mrf.mxu3 }
 0x100   : > { %v446_v55 = vpop.f32.mrf.mxu0  ;;  %v466_v56 = vpop.f32.mrf.mxu1  ;;  %534 = vst [vmem:[%s1658_s24 + $0xa8] sm:$0xff] %v1728_v54  ;;  %v601_v0 = vmul.f32 %v1728_v54, %v1728_v54 }
 0x101   : > { %519 = vst [vmem:[%s1658_s24 + $0x30] sm:$0xff] %v446_v55  ;;  %v586_v2 = vmul.f32 %v446_v55, %v446_v55  ;;  %v551_v4 = vadd.f32 %v550_v1, %v446_v55  ;;  %v594_v44 = vmul.f32 %v466_v56, %v466_v56 }
 0x102   : > { %527 = vst [vmem:[%s1658_s24 + $0x70] sm:$0xff] %v466_v56 }
 0x103   : > { %542 = vst [vmem:[%s1658_s24 + $0xe8] sm:$0xff] %v1733_v60  ;;  %v617_v8 = vadd.f32 %v616_v3, %v586_v2 }
 0x107   : > { %v486_v5 = vpop.f32.mrf.mxu2  ;;  %v1740_v11 = vpop.f32.mrf.mxu3 }
 0x108   : > { %v448_v6 = vpop.f32.mrf.mxu0  ;;  %v468_v7 = vpop.f32.mrf.mxu1  ;;  %535 = vst [vmem:[%s1658_s24 + $0xb0] sm:$0xff] %v486_v5  ;;  %v602_v3 = vmul.f32 %v486_v5, %v486_v5 }
 0x109   : > { %520 = vst [vmem:[%s1658_s24 + $0x38] sm:$0xff] %v448_v6  ;;  %v552_v9 = vadd.f32 %v551_v4, %v448_v6  ;;  %v587_v10 = vmul.f32 %v448_v6, %v448_v6 }
 0x10a   : > { %528 = vst [vmem:[%s1658_s24 + $0x78] sm:$0xff] %v468_v7 }
 0x10b   : > { %v553_v13 = vadd.f32 %v552_v9, %v1656_v26  ;;  %v618_v14 = vadd.f32 %v617_v8, %v587_v10  ;;  %543 = vst [vmem:[%s1658_s24 + $0xf0] sm:$0xff] %v1740_v11  ;;  %v592_v26 = vmul.f32 %v1704_v41, %v1704_v41 }
 0x10d   : > { %v554_v16 = vadd.f32 %v553_v13, %v1665_v29  ;;  %v619_v17 = vadd.f32 %v618_v14, %v588_v12  ;;  %v607_v14 = vmul.f32 %v1709_v42, %v1709_v42 }
 0x10f   : > { %v555_v19 = vadd.f32 %v554_v16, %v1678_v33  ;;  %v620_v20 = vadd.f32 %v619_v17, %v589_v15  ;;  %v488_v21 = vpop.f32.mrf.mxu2  ;;  %v508_v25 = vpop.f32.mrf.mxu3 }
 0x110   : > { %536 = vst [vmem:[%s1658_s24 + $0xb8] sm:$0xff] %v488_v21 }
 0x111   : > { %v621_v23 = vadd.f32 %v620_v20, %v590_v18  ;;  %v556_v24 = vadd.f32 %v555_v19, %v1691_v37  ;;  %544 = vst [vmem:[%s1658_s24 + $0xf8] sm:$0xff] %v508_v25  ;;  %v595_v37 = vmul.f32 %v468_v7, %v468_v7  ;;  %v609_v19 = vmul.f32 %v1733_v60, %v1733_v60 }
 0x113   : > { %v557_v28 = vadd.f32 %v556_v24, %v1704_v41  ;;  %v622_v29 = vadd.f32 %v621_v23, %v591_v22  ;;  %v597_v41 = vmul.f32 %v1676_v31, %v1676_v31  ;;  %v610_v22 = vmul.f32 %v1740_v11, %v1740_v11  ;;  %v545_v23 = vld [vmem:[#allocation3] sm:$0xff] }
 0x115   : > { %v558_v33 = vadd.f32 %v557_v28, %v1717_v45  ;;  %v623_v36 = vadd.f32 %v622_v29, %v592_v26  ;;  %v598_v45 = vmul.f32 %v1689_v35, %v1689_v35  ;;  %v611_v26 = vmul.f32 %v508_v25, %v508_v25  ;;  %v579_v28 = vld [vmem:[#allocation4] sm:$0xff] }
 0x117   : > { %v559_v40 = vadd.f32 %v558_v33, %v466_v56  ;;  %v624_v47 = vadd.f32 %v623_v36, %v593_v32 }
 0x119   : > { %v625_v48 = vadd.f32 %v624_v47, %v594_v44  ;;  %v560_v49 = vadd.f32 %v559_v40, %v468_v7  ;;  %v603_v7 = vmul.f32 %v488_v21, %v488_v21 }
 0x11b   : > { %v561_v51 = vadd.f32 %v560_v49, %v1663_v27  ;;  %v626_v52 = vadd.f32 %v625_v48, %v595_v37  ;;  %v600_v27 = vmul.f32 %v1715_v43, %v1715_v43 }
 0x11d   : > { %v562_v53 = vadd.f32 %v561_v51, %v1676_v31  ;;  %v627_v55 = vadd.f32 %v626_v52, %v596_v50 }
 0x11f   : > { %v563_v56 = vadd.f32 %v562_v53, %v1689_v35  ;;  %v628_v57 = vadd.f32 %v627_v55, %v597_v41 }
 0x121   : > { %v629_v59 = vadd.f32 %v628_v57, %v598_v45  ;;  %v564_v61 = vadd.f32 %v563_v56, %v1702_v39  ;;  %v604_v39 = vmul.f32 %v1670_v30, %v1670_v30 }
 0x123   : > { %v565_v62 = vadd.f32 %v564_v61, %v1715_v43  ;;  %v630_v63 = vadd.f32 %v629_v59, %v599_v58  ;;  %v605_v43 = vmul.f32 %v1683_v34, %v1683_v34 }
 0x125   : > { %v566_v31 = vadd.f32 %v565_v62, %v1728_v54  ;;  %v631_v1 = vadd.f32 %v630_v63, %v600_v27  ;;  %v606_v54 = vmul.f32 %v1696_v38, %v1696_v38 }
 0x127   : > { %v632_v35 = vadd.f32 %v631_v1, %v601_v0  ;;  %v567_v2 = vadd.f32 %v566_v31, %v486_v5 }
 0x129   : > { %v633_v4 = vadd.f32 %v632_v35, %v602_v3  ;;  %v568_v6 = vadd.f32 %v567_v2, %v488_v21 }
 0x12b   : > { %v569_v8 = vadd.f32 %v568_v6, %v1670_v30  ;;  %v634_v9 = vadd.f32 %v633_v4, %v603_v7  ;;  %v608_v30 = vmul.f32 %v1722_v46, %v1722_v46 }
 0x12d   : > { %v570_v10 = vadd.f32 %v569_v8, %v1683_v34  ;;  %v635_v12 = vadd.f32 %v634_v9, %v604_v39 }
 0x12f   : > { %v571_v5 = vadd.f32 %v570_v10, %v1696_v38  ;;  %v636_v13 = vadd.f32 %v635_v12, %v605_v43 }
 0x131   : > { %v637_v15 = vadd.f32 %v636_v13, %v606_v54  ;;  %v572_v16 = vadd.f32 %v571_v5, %v1709_v42 }
 0x133   : > { %v573_v17 = vadd.f32 %v572_v16, %v1722_v46  ;;  %v638_v18 = vadd.f32 %v637_v15, %v607_v14 }
 0x135   : > { %v574_v34 = vadd.f32 %v573_v17, %v1733_v60  ;;  %v639_v20 = vadd.f32 %v638_v18, %v608_v30 }
 0x137   : > { %v640_v38 = vadd.f32 %v639_v20, %v609_v19  ;;  %v575_v21 = vadd.f32 %v574_v34, %v1740_v11 }
 0x139   : > { %v641_v42 = vadd.f32 %v640_v38, %v610_v22  ;;  %v576_v24 = vadd.f32 %v575_v21, %v508_v25 }
 0x13b   : > { %v577_v29 = vadd.f32 %v576_v24, %v545_v23  ;;  %v642_v46 = vadd.f32 %v641_v42, %v611_v26  ;;  %648 = sbr.rel (%p1261_p1) target bundleno = 671 (0x29f), region = 52 }
 0x13d   : > { %578 = vst [vmem:[#allocation3] sm:$0xff] %v577_v29  ;;  %v643_v32 = vadd.f32 %v642_v46, %v579_v28 }
 0x13f   : > { %644 = vst [vmem:[#allocation4] sm:$0xff] %v643_v32 }
 0x140   : > { %v679_v31 = vld [vmem:[%s1962_s2] sm:$0x1]  ;;  %v685_v39 = vld [vmem:[#allocation2 + $0x8] sm:$0xff]  ;;  %v686_v54 = vld [vmem:[#allocation2 + $0x10] sm:$0xff] }
 0x141   : > { %v681_v35 = vld [vmem:[%s1963_s3] sm:$0x1]  ;;  %v687_v15 = vld [vmem:[#allocation2 + $0x18] sm:$0xff]  ;;  %v689_v38 = vld [vmem:[#allocation2 + $0x28] sm:$0xff] }
 0x142   : > { %v684_v2 = vld [vmem:[#allocation2] sm:$0xff]  ;;  %v690_v42 = vld [vmem:[#allocation2 + $0x30] sm:$0xff]  ;;  %v691_v29 = vld [vmem:[#allocation2 + $0x38] sm:$0xff] }
 0x143   : > { %v688_v18 = vld [vmem:[#allocation2 + $0x20] sm:$0xff] }
 0x144   : > { %v649_v60 = vld [vmem:[#allocation3] sm:$0xff] }
 0x145   : > { %v650_v36 = vrot.slane %v649_v60, 4 }
 0x146   : > { %v656_v33 = vld [vmem:[#allocation4] sm:$0xff] }
 0x147   : > { %v657_v40 = vrot.slane %v656_v33, 4  ;;  %v651_v44 = vadd.f32 %v650_v36, %v649_v60 }
 0x149   : > { %v658_v47 = vadd.f32 %v657_v40, %v656_v33  ;;  %v652_v11 = vrot.slane %v651_v44, 2  ;;  %v692_v33 = vld [vmem:[#allocation2 + $0x40] sm:$0xff] }
 0x14b   : > { %v659_v48 = vrot.slane %v658_v47, 2  ;;  %v653_v49 = vadd.f32 %v652_v11, %v651_v44 }
 0x14d   : > { %v660_v37 = vadd.f32 %v659_v48, %v658_v47  ;;  %v654_v25 = vrot.slane %v653_v49, 1  ;;  %v693_v47 = vld [vmem:[#allocation2 + $0x48] sm:$0xff] }
 0x14f   : > { %v661_v50 = vrot.slane %v660_v37, 1  ;;  %v655_v51 = vadd.f32 %v654_v25, %v653_v49 }
 0x151   : > { %v662_v52 = vadd.f32 %v661_v50, %v660_v37  ;;  %v663_v41 = vmul.f32 0.001953125, %v655_v51  ;;  %v694_v37 = vld [vmem:[#allocation2 + $0x50] sm:$0xff] }
 0x153   : > { %v664_v53 = vmul.f32 0.001953125, %v662_v52  ;;  %v665_v55 = vmul.f32 %v663_v41, %v663_v41  ;;  %v695_v52 = vld [vmem:[#allocation2 + $0x58] sm:$0xff] }
 0x155   : > { %v666_v45 = vsub.f32 %v664_v53, %v665_v55 }
 0x157   : > { %v667_v56 = vmax.f32 %v666_v45, 0.0  ;;  %v696_v45 = vld [vmem:[#allocation2 + $0x60] sm:$0xff] }
 0x159   : > { %v668_v57 = vadd.f32 1e-05, %v667_v56 }
 0x15b   : > { %1377 = vrsqrt.f32 %v668_v57  ;;  %vm675_vm0 = vweird.f32 %v668_v57 }
 0x161   : > { %v1378_v58 = vpop.eup %1377 }
 0x162   : > { %v670_v59 = vmul.f32 %v1378_v58, %v668_v57  ;;  %vm676_vm1 = vweird.f32 %v1378_v58 }
 0x163   : > { %vm677_vm2 = vmor %vm675_vm0, %vm676_vm1 }
 0x164   : > { %v671_v61 = vmul.f32 %v1378_v58, %v670_v59  ;;  %v700_v59 = vld [vmem:[#allocation2 + $0x80] sm:$0xff] }
 0x166   : > { %v672_v27 = vmul.f32 0.5, %v671_v61  ;;  %v697_v61 = vld [vmem:[#allocation2 + $0x68] sm:$0xff] }
 0x168   : > { %v673_v62 = vsub.f32 1.5, %v672_v27 }
 0x16a   : > { %v674_v63 = vmul.f32 %v1378_v58, %v673_v62 }
 0x16c   : > { %v678_v0 = vsel %vm677_vm2, %v1378_v58, %v674_v63 }
 0x16d   : > { %v680_v1 = vmul.f32 %v679_v31, %v678_v0 }
 0x16f   : > { %v682_v3 = vmul.f32 %v680_v1, %v663_v41  ;;  %v1811_v4 = vperm.slane %v680_v1, 0 }
 0x171   : > { %v683_v6 = vsub.f32 %v681_v35, %v682_v3  ;;  %v719_v7 = vmul.f32 %v1811_v4, %v684_v2  ;;  %v720_v43 = vmul.f32 %v1811_v4, %v685_v39  ;;  %v721_v13 = vmul.f32 %v1811_v4, %v686_v54  ;;  %v701_v35 = vld [vmem:[#allocation2 + $0x88] sm:$0xff]  ;;  %v698_v2 = vld [vmem:[#allocation2 + $0x70] sm:$0xff] }
 0x172   : > { %v722_v30 = vmul.f32 %v1811_v4, %v687_v15  ;;  %v723_v19 = vmul.f32 %v1811_v4, %v688_v18  ;;  %v724_v22 = vmul.f32 %v1811_v4, %v689_v38  ;;  %v725_v26 = vmul.f32 %v1811_v4, %v690_v42  ;;  %v886_v18 = vld [vmem:[#allocation2 + $0x108] sm:$0xff] }
 0x173   : > { %v1814_v8 = vperm.slane %v683_v6, 0  ;;  %v726_v32 = vmul.f32 %v1811_v4, %v691_v29  ;;  %v727_v40 = vmul.f32 %v1811_v4, %v692_v33  ;;  %v728_v48 = vmul.f32 %v1811_v4, %v693_v47  ;;  %v887_v29 = vld [vmem:[#allocation2 + $0x110] sm:$0xff] }
 0x174   : > { %v729_v50 = vmul.f32 %v1811_v4, %v694_v37  ;;  %v730_v53 = vmul.f32 %v1811_v4, %v695_v52  ;;  %v731_v57 = vmul.f32 %v1811_v4, %v696_v45  ;;  %v735_v27 = vmul.f32 %v1811_v4, %v700_v59  ;;  %v888_v37 = vld [vmem:[#allocation2 + $0x118] sm:$0xff]  ;;  %v889_v59 = vld [vmem:[#allocation2 + $0x120] sm:$0xff] }
 0x175   : > { %v754_v9 = vadd.f32 %v1814_v8, %v719_v7  ;;  %v755_v12 = vadd.f32 %v1814_v8, %v720_v43  ;;  %v756_v14 = vadd.f32 %v1814_v8, %v721_v13  ;;  %v757_v17 = vadd.f32 %v1814_v8, %v722_v30  ;;  %v699_v13 = vld [vmem:[#allocation2 + $0x78] sm:$0xff] }
 0x176   : > { %v758_v20 = vadd.f32 %v1814_v8, %v723_v19  ;;  %v759_v23 = vadd.f32 %v1814_v8, %v724_v22  ;;  %v760_v28 = vadd.f32 %v1814_v8, %v725_v26  ;;  %v761_v60 = vadd.f32 %v1814_v8, %v726_v32  ;;  %v901_v22 = vld [vmem:[#allocation2 + $0x180] sm:$0xff] }
 0x177   : > { %v786_v10 = vmax.f32 %v754_v9, 0.0  ;;  %v787_v5 = vmax.f32 %v755_v12, 0.0  ;;  %v788_v16 = vmax.f32 %v756_v14, 0.0  ;;  %v789_v34 = vmax.f32 %v757_v17, 0.0  ;;  %v885_v9 = vld [vmem:[#allocation2 + $0x100] sm:$0xff] }
 0x178   : > { %v790_v21 = vmax.f32 %v758_v20, 0.0  ;;  %v791_v24 = vmax.f32 %v759_v23, 0.0  ;;  %v792_v46 = vmax.f32 %v760_v28, 0.0  ;;  %v793_v36 = vmax.f32 %v761_v60, 0.0 }
 0x179   : > { %818 = vxpose.xlu0.b32.start [1/16] (narrow) %v786_v10, 8  ;;  %v762_v44 = vadd.f32 %v1814_v8, %v727_v40  ;;  %v763_v49 = vadd.f32 %v1814_v8, %v728_v48  ;;  %v764_v51 = vadd.f32 %v1814_v8, %v729_v50  ;;  %v765_v55 = vadd.f32 %v1814_v8, %v730_v53  ;;  %v902_v40 = vld [vmem:[#allocation2 + $0x188] sm:$0xff]  ;;  %v903_v53 = vld [vmem:[#allocation2 + $0x190] sm:$0xff] }
 0x17a   : > { %v766_v58 = vadd.f32 %v1814_v8, %v731_v57  ;;  %v770_v62 = vadd.f32 %v1814_v8, %v735_v27  ;;  %v732_v31 = vmul.f32 %v1811_v4, %v697_v61  ;;  %v736_v3 = vmul.f32 %v1811_v4, %v701_v35 }
 0x17b   : > { %v794_v11 = vmax.f32 %v762_v44, 0.0  ;;  %v795_v25 = vmax.f32 %v763_v49, 0.0  ;;  %v796_v41 = vmax.f32 %v764_v51, 0.0  ;;  %v797_v56 = vmax.f32 %v765_v55, 0.0 }
 0x17c   : > { %v798_v63 = vmax.f32 %v766_v58, 0.0  ;;  %v802_v0 = vmax.f32 %v770_v62, 0.0  ;;  %v767_v1 = vadd.f32 %v1814_v8, %v732_v31  ;;  %v771_v6 = vadd.f32 %v1814_v8, %v736_v3  ;;  %v706_v31 = vld [vmem:[#allocation2 + $0xb0] sm:$0xff] }
 0x17d   : > { %v733_v39 = vmul.f32 %v1811_v4, %v698_v2  ;;  %v917_v10 = vmul.f32 %v885_v9, %v1811_v4  ;;  %v734_v17 = vmul.f32 %v1811_v4, %v699_v13  ;;  %v918_v19 = vmul.f32 %v886_v18, %v1811_v4 }
 0x17e   : > { %850 = vxpose.xlu1.b32.start [1/16] (narrow) %v802_v0, 8  ;;  %v799_v7 = vmax.f32 %v767_v1, 0.0  ;;  %v803_v43 = vmax.f32 %v771_v6, 0.0  ;;  %v933_v28 = vmul.f32 %v901_v22, %v1811_v4  ;;  %v919_v32 = vmul.f32 %v887_v29, %v1811_v4  ;;  %v904_v0 = vld [vmem:[#allocation2 + $0x198] sm:$0xff] }
 0x17f   : > { %v949_v12 = vadd.f32 %v917_v10, %v1814_v8  ;;  %v768_v54 = vadd.f32 %v1814_v8, %v733_v39  ;;  %v950_v20 = vadd.f32 %v918_v19, %v1814_v8  ;;  %v769_v38 = vadd.f32 %v1814_v8, %v734_v17 }
 0x180   : > { %v951_v60 = vadd.f32 %v919_v32, %v1814_v8  ;;  %v965_v33 = vadd.f32 %v933_v28, %v1814_v8  ;;  %v934_v49 = vmul.f32 %v902_v40, %v1811_v4  ;;  %v920_v50 = vmul.f32 %v888_v37, %v1811_v4 }
 0x181   : > { %819 = vxpose.xlu0.b32.cont [2/16] (narrow) %v787_v5, 8  ;;  %v702_v5 = vld [vmem:[#allocation2 + $0x90] sm:$0xff]  ;;  %v981_v14 = vmax.f32 %v949_v12, 0.0  ;;  %v800_v30 = vmax.f32 %v768_v54, 0.0  ;;  %v982_v23 = vmax.f32 %v950_v20, 0.0  ;;  %v801_v26 = vmax.f32 %v769_v38, 0.0 }
 0x182   : > { %v737_v15 = vmul.f32 %v1811_v4, %v702_v5  ;;  %v983_v44 = vmax.f32 %v951_v60, 0.0  ;;  %v997_v48 = vmax.f32 %v965_v33, 0.0  ;;  %v952_v51 = vadd.f32 %v920_v50, %v1814_v8  ;;  %v707_v12 = vld [vmem:[#allocation2 + $0xb8] sm:$0xff]  ;;  %v905_v54 = vld [vmem:[#allocation2 + $0x1a0] sm:$0xff]  ;;  %v906_v38 = vld [vmem:[#allocation2 + $0x1a8] sm:$0xff] }
 0x183   : > { %1013 = vxpose.xlu2.b32.start [1/16] (narrow) %v981_v14, 8  ;;  %v966_v52 = vadd.f32 %v934_v49, %v1814_v8  ;;  %v935_v58 = vmul.f32 %v903_v53, %v1811_v4  ;;  %v921_v27 = vmul.f32 %v889_v59, %v1811_v4  ;;  %v741_v35 = vmul.f32 %v1811_v4, %v706_v31  ;;  %v708_v20 = vld [vmem:[#allocation2 + $0xc0] sm:$0xff]  ;;  %v709_v60 = vld [vmem:[#allocation2 + $0xc8] sm:$0xff]  ;;  %v907_v33 = vld [vmem:[#allocation2 + $0x1b0] sm:$0xff] }
 0x184   : > { %v984_v55 = vmax.f32 %v952_v51, 0.0  ;;  %v936_v6 = vmul.f32 %v904_v0, %v1811_v4  ;;  %v742_v13 = vmul.f32 %v1811_v4, %v707_v12  ;;  %v743_v22 = vmul.f32 %v1811_v4, %v708_v20  ;;  %v710_v51 = vld [vmem:[#allocation2 + $0xd0] sm:$0xff] }
 0x185   : > { %v998_v57 = vmax.f32 %v966_v52, 0.0  ;;  %v953_v62 = vadd.f32 %v921_v27, %v1814_v8  ;;  %v776_v2 = vadd.f32 %v1814_v8, %v741_v35  ;;  %v744_v40 = vmul.f32 %v1811_v4, %v709_v60  ;;  %v908_v52 = vld [vmem:[#allocation2 + $0x1b8] sm:$0xff] }
 0x186   : > { %851 = vxpose.xlu1.b32.cont [2/16] (narrow) %v803_v43, 8  ;;  %v968_v10 = vadd.f32 %v936_v6, %v1814_v8  ;;  %v777_v14 = vadd.f32 %v1814_v8, %v742_v13  ;;  %v745_v53 = vmul.f32 %v1811_v4, %v710_v51 }
 0x187   : > { %v985_v1 = vmax.f32 %v953_v62, 0.0  ;;  %v808_v39 = vmax.f32 %v776_v2, 0.0  ;;  %v711_v62 = vld [vmem:[#allocation2 + $0xd8] sm:$0xff] }
 0x188   : > { %v809_v17 = vmax.f32 %v777_v14, 0.0  ;;  %v746_v0 = vmul.f32 %v1811_v4, %v711_v62  ;;  %v914_v62 = vld [vmem:[#allocation2 + $0x1e8] sm:$0xff] }
 0x189   : > { %820 = vxpose.xlu0.b32.cont [3/16] (narrow) %v788_v16, 8  ;;  %v772_v16 = vadd.f32 %v1814_v8, %v737_v15  ;;  %v1000_v15 = vmax.f32 %v968_v10, 0.0  ;;  %v910_v10 = vld [vmem:[#allocation2 + $0x1c8] sm:$0xff] }
 0x18a   : > { %v942_v14 = vmul.f32 %v910_v10, %v1811_v4 }
 0x18b   : > { %1014 = vxpose.xlu2.b32.cont [2/16] (narrow) %v982_v23, 8  ;;  %v778_v23 = vadd.f32 %v1814_v8, %v743_v22 }
 0x18d   : > { %v810_v28 = vmax.f32 %v778_v23, 0.0 }
 0x191   : > { %821 = vxpose.xlu0.b32.cont [4/16] (narrow) %v789_v34, 8  ;;  %v804_v34 = vmax.f32 %v772_v16, 0.0  ;;  %v937_v16 = vmul.f32 %v905_v54, %v1811_v4 }
 0x193   : > { %852 = vxpose.xlu1.b32.cont [3/16] (narrow) %v804_v34, 8  ;;  %1015 = vxpose.xlu2.b32.cont [3/16] (narrow) %v983_v44, 8  ;;  %v969_v19 = vadd.f32 %v937_v16, %v1814_v8  ;;  %v779_v44 = vadd.f32 %v1814_v8, %v744_v40 }
 0x195   : > { %v811_v49 = vmax.f32 %v779_v44, 0.0 }
 0x199   : > { %822 = vxpose.xlu0.b32.cont [5/16] (narrow) %v790_v21, 8  ;;  %v703_v21 = vld [vmem:[#allocation2 + $0x98] sm:$0xff] }
 0x19a   : > { %v738_v42 = vmul.f32 %v1811_v4, %v703_v21 }
 0x19b   : > { %1016 = vxpose.xlu2.b32.cont [4/16] (narrow) %v984_v55, 8  ;;  %v780_v55 = vadd.f32 %v1814_v8, %v745_v53 }
 0x1a1   : > { %823 = vxpose.xlu0.b32.cont [6/16] (narrow) %v791_v24, 8  ;;  %v773_v24 = vadd.f32 %v1814_v8, %v738_v42  ;;  %v1001_v42 = vmax.f32 %v969_v19, 0.0  ;;  %v911_v19 = vld [vmem:[#allocation2 + $0x1d0] sm:$0xff] }
 0x1a2   : > { %v943_v23 = vmul.f32 %v911_v19, %v1811_v4 }
 0x1a3   : > { %1017 = vxpose.xlu2.b32.cont [5/16] (narrow) %v985_v1, 8  ;;  %v781_v1 = vadd.f32 %v1814_v8, %v746_v0 }
 0x1a5   : > { %v813_v6 = vmax.f32 %v781_v1, 0.0 }
 0x1a9   : > { %824 = vxpose.xlu0.b32.cont [7/16] (narrow) %v792_v46, 8  ;;  %v805_v46 = vmax.f32 %v773_v24, 0.0  ;;  %v938_v24 = vmul.f32 %v906_v38, %v1811_v4 }
 0x1ab   : > { %853 = vxpose.xlu1.b32.cont [4/16] (narrow) %v805_v46, 8  ;;  %v970_v32 = vadd.f32 %v938_v24, %v1814_v8 }
 0x1b1   : > { %825 = vxpose.xlu0.b32.cont [8/16] (narrow) %v793_v36, 8  ;;  %v704_v36 = vld [vmem:[#allocation2 + $0xa0] sm:$0xff] }
 0x1b2   : > { %v739_v47 = vmul.f32 %v1811_v4, %v704_v36 }
 0x1b9   : > { %826 = vxpose.xlu0.b32.cont [9/16] (narrow) %v794_v11, 8  ;;  %v774_v11 = vadd.f32 %v1814_v8, %v739_v47  ;;  %v1002_v47 = vmax.f32 %v970_v32, 0.0  ;;  %v912_v32 = vld [vmem:[#allocation2 + $0x1d8] sm:$0xff] }
 0x1ba   : > { %v944_v44 = vmul.f32 %v912_v32, %v1811_v4 }
 0x1c1   : > { %827 = vxpose.xlu0.b32.cont [10/16] (narrow) %v795_v25, 8  ;;  %v806_v25 = vmax.f32 %v774_v11, 0.0  ;;  %v939_v11 = vmul.f32 %v907_v33, %v1811_v4 }
 0x1c3   : > { %854 = vxpose.xlu1.b32.cont [5/16] (narrow) %v806_v25, 8  ;;  %v971_v50 = vadd.f32 %v939_v11, %v1814_v8 }
 0x1c9   : > { %828 = vxpose.xlu0.b32.cont [11/16] (narrow) %v796_v41, 8  ;;  %v705_v41 = vld [vmem:[#allocation2 + $0xa8] sm:$0xff] }
 0x1ca   : > { %v740_v45 = vmul.f32 %v1811_v4, %v705_v41 }
 0x1d1   : > { %829 = vxpose.xlu0.b32.cont [12/16] (narrow) %v797_v56, 8  ;;  %v775_v56 = vadd.f32 %v1814_v8, %v740_v45  ;;  %v1003_v45 = vmax.f32 %v971_v50, 0.0  ;;  %v913_v50 = vld [vmem:[#allocation2 + $0x1e0] sm:$0xff] }
 0x1d3   : > { %v807_v61 = vmax.f32 %v775_v56, 0.0  ;;  %v940_v56 = vmul.f32 %v908_v52, %v1811_v4 }
 0x1d5   : > { %855 = vxpose.xlu1.b32.cont [6/16] (narrow) %v807_v61, 8  ;;  %v972_v27 = vadd.f32 %v940_v56, %v1814_v8 }
 0x1d7   : > { %v1004_v35 = vmax.f32 %v972_v27, 0.0 }
 0x1d9   : > { %830 = vxpose.xlu0.b32.cont [13/16] (narrow) %v798_v63, 8  ;;  %v967_v63 = vadd.f32 %v935_v58, %v1814_v8  ;;  %v812_v58 = vmax.f32 %v780_v55, 0.0  ;;  %v945_v55 = vmul.f32 %v913_v50, %v1811_v4 }
 0x1db   : > { %v999_v3 = vmax.f32 %v967_v63, 0.0  ;;  %v909_v63 = vld [vmem:[#allocation2 + $0x1c0] sm:$0xff] }
 0x1dc   : > { %v941_v2 = vmul.f32 %v909_v63, %v1811_v4 }
 0x1dd   : > { %856 = vxpose.xlu1.b32.cont [7/16] (narrow) %v808_v39, 8 }
 0x1e1   : > { %831 = vxpose.xlu0.b32.cont [14/16] (narrow) %v799_v7, 8  ;;  %v890_v7 = vld [vmem:[#allocation2 + $0x128] sm:$0xff] }
 0x1e2   : > { %v922_v9 = vmul.f32 %v890_v7, %v1811_v4 }
 0x1e4   : > { %v954_v43 = vadd.f32 %v922_v9, %v1814_v8  ;;  %v973_v9 = vadd.f32 %v941_v2, %v1814_v8 }
 0x1e5   : > { %857 = vxpose.xlu1.b32.cont [8/16] (narrow) %v809_v17, 8 }
 0x1e6   : > { %v986_v5 = vmax.f32 %v954_v43, 0.0  ;;  %v712_v43 = vld [vmem:[#allocation2 + $0xe0] sm:$0xff]  ;;  %v1005_v13 = vmax.f32 %v973_v9, 0.0 }
 0x1e7   : > { %v747_v54 = vmul.f32 %v1811_v4, %v712_v43  ;;  %v916_v43 = vld [vmem:[#allocation2 + $0x1f8] sm:$0xff] }
 0x1e8   : > { %1018 = vxpose.xlu2.b32.cont [6/16] (narrow) %v986_v5, 8 }
 0x1e9   : > { %832 = vxpose.xlu0.b32.cont [15/16] (narrow) %v800_v30, 8  ;;  %v891_v30 = vld [vmem:[#allocation2 + $0x130] sm:$0xff]  ;;  %v782_v5 = vadd.f32 %v1814_v8, %v747_v54 }
 0x1ea   : > { %v923_v18 = vmul.f32 %v891_v30, %v1811_v4 }
 0x1eb   : > { %v814_v16 = vmax.f32 %v782_v5, 0.0 }
 0x1ec   : > { %v955_v34 = vadd.f32 %v923_v18, %v1814_v8  ;;  %v974_v18 = vadd.f32 %v942_v14, %v1814_v8 }
 0x1ed   : > { %858 = vxpose.xlu1.b32.cont [9/16] (narrow) %v810_v28, 8 }
 0x1ee   : > { %v987_v21 = vmax.f32 %v955_v34, 0.0  ;;  %v713_v34 = vld [vmem:[#allocation2 + $0xe8] sm:$0xff]  ;;  %v1006_v22 = vmax.f32 %v974_v18, 0.0 }
 0x1ef   : > { %v748_v38 = vmul.f32 %v1811_v4, %v713_v34 }
 0x1f0   : > { %1019 = vxpose.xlu2.b32.cont [7/16] (narrow) %v987_v21, 8 }
 0x1f1   : > { %833 = vxpose.xlu0.b32.end [16/16] (narrow) %v801_v26, 8  ;;  %v892_v26 = vld [vmem:[#allocation2 + $0x138] sm:$0xff]  ;;  %v783_v21 = vadd.f32 %v1814_v8, %v748_v38 }
 0x1f2   : > { %v924_v29 = vmul.f32 %v892_v26, %v1811_v4 }
 0x1f3   : > { %v815_v24 = vmax.f32 %v783_v21, 0.0 }
 0x1f4   : > { %v956_v46 = vadd.f32 %v924_v29, %v1814_v8  ;;  %v975_v29 = vadd.f32 %v943_v23, %v1814_v8 }
 0x1f5   : > { %859 = vxpose.xlu1.b32.cont [10/16] (narrow) %v811_v49, 8 }
 0x1f6   : > { %v988_v36 = vmax.f32 %v956_v46, 0.0  ;;  %v714_v46 = vld [vmem:[#allocation2 + $0xf0] sm:$0xff]  ;;  %v1007_v40 = vmax.f32 %v975_v29, 0.0 }
 0x1f7   : > { %v749_v33 = vmul.f32 %v1811_v4, %v714_v46 }
 0x1f8   : > { %1020 = vxpose.xlu2.b32.cont [8/16] (narrow) %v988_v36, 8 }
 0x1f9   : > { %1045 = vxpose.xlu0.b32.start [1/16] (narrow) %v997_v48, 8  ;;  %v893_v48 = vld [vmem:[#allocation2 + $0x140] sm:$0xff]  ;;  %v784_v36 = vadd.f32 %v1814_v8, %v749_v33 }
 0x1fa   : > { %v925_v37 = vmul.f32 %v893_v48, %v1811_v4 }
 0x1fb   : > { %v816_v11 = vmax.f32 %v784_v36, 0.0 }
 0x1fc   : > { %v957_v25 = vadd.f32 %v925_v37, %v1814_v8  ;;  %v976_v37 = vadd.f32 %v944_v44, %v1814_v8 }
 0x1fd   : > { %860 = vxpose.xlu1.b32.cont [11/16] (narrow) %v812_v58, 8 }
 0x1fe   : > { %v989_v41 = vmax.f32 %v957_v25, 0.0  ;;  %v715_v25 = vld [vmem:[#allocation2 + $0xf8] sm:$0xff]  ;;  %v1008_v53 = vmax.f32 %v976_v37, 0.0 }
 0x1ff   : > { %v750_v52 = vmul.f32 %v1811_v4, %v715_v25 }
 0x200   : > { %1021 = vxpose.xlu2.b32.cont [9/16] (narrow) %v989_v41, 8 }
 0x201   : > { %1046 = vxpose.xlu0.b32.cont [2/16] (narrow) %v998_v57, 8  ;;  %v894_v57 = vld [vmem:[#allocation2 + $0x148] sm:$0xff]  ;;  %v785_v41 = vadd.f32 %v1814_v8, %v750_v52 }
 0x202   : > { %v926_v59 = vmul.f32 %v894_v57, %v1811_v4 }
 0x203   : > { %v817_v56 = vmax.f32 %v785_v41, 0.0 }
 0x204   : > { %v958_v61 = vadd.f32 %v926_v59, %v1814_v8  ;;  %v977_v59 = vadd.f32 %v945_v55, %v1814_v8 }
 0x205   : > { %861 = vxpose.xlu1.b32.cont [12/16] (narrow) %v813_v6, 8  ;;  %v915_v6 = vld [vmem:[#allocation2 + $0x1f0] sm:$0xff] }
 0x206   : > { %v990_v31 = vmax.f32 %v958_v61, 0.0  ;;  %v900_v61 = vld [vmem:[#allocation2 + $0x178] sm:$0xff]  ;;  %v1009_v1 = vmax.f32 %v977_v59, 0.0 }
 0x208   : > { %1022 = vxpose.xlu2.b32.cont [10/16] (narrow) %v990_v31, 8  ;;  %v932_v31 = vmul.f32 %v900_v61, %v1811_v4 }
 0x209   : > { %1047 = vxpose.xlu0.b32.cont [3/16] (narrow) %v999_v3, 8  ;;  %v895_v3 = vld [vmem:[#allocation2 + $0x150] sm:$0xff] }
 0x20a   : > { %v927_v7 = vmul.f32 %v895_v3, %v1811_v4  ;;  %v964_v0 = vadd.f32 %v932_v31, %v1814_v8 }
 0x20c   : > { %v959_v39 = vadd.f32 %v927_v7, %v1814_v8  ;;  %v996_v2 = vmax.f32 %v964_v0, 0.0 }
 0x20d   : > { %862 = vxpose.xlu1.b32.cont [13/16] (narrow) %v814_v16, 8 }
 0x20e   : > { %v991_v12 = vmax.f32 %v959_v39, 0.0  ;;  %v947_v39 = vmul.f32 %v915_v6, %v1811_v4 }
 0x210   : > { %1023 = vxpose.xlu2.b32.cont [11/16] (narrow) %v991_v12, 8  ;;  %v979_v9 = vadd.f32 %v947_v39, %v1814_v8  ;;  %v948_v12 = vmul.f32 %v916_v43, %v1811_v4 }
 0x211   : > { %1048 = vxpose.xlu0.b32.cont [4/16] (narrow) %v1000_v15, 8  ;;  %v896_v15 = vld [vmem:[#allocation2 + $0x158] sm:$0xff] }
 0x212   : > { %v928_v30 = vmul.f32 %v896_v15, %v1811_v4  ;;  %v1011_v10 = vmax.f32 %v979_v9, 0.0  ;;  %v980_v54 = vadd.f32 %v948_v12, %v1814_v8 }
 0x214   : > { %v960_v17 = vadd.f32 %v928_v30, %v1814_v8  ;;  %v1012_v5 = vmax.f32 %v980_v54, 0.0 }
 0x215   : > { %863 = vxpose.xlu1.b32.cont [14/16] (narrow) %v815_v24, 8 }
 0x216   : > { %v992_v20 = vmax.f32 %v960_v17, 0.0 }
 0x218   : > { %1024 = vxpose.xlu2.b32.cont [12/16] (narrow) %v992_v20, 8 }
 0x219   : > { %1049 = vxpose.xlu0.b32.cont [5/16] (narrow) %v1001_v42, 8  ;;  %v897_v42 = vld [vmem:[#allocation2 + $0x160] sm:$0xff] }
 0x21a   : > { %v929_v26 = vmul.f32 %v897_v42, %v1811_v4 }
 0x21c   : > { %v961_v28 = vadd.f32 %v929_v26, %v1814_v8 }
 0x21d   : > { %864 = vxpose.xlu1.b32.cont [15/16] (narrow) %v816_v11, 8  ;;  %v834_v27 = vpop.trf.xlu0 }
 0x21e   : > { %v993_v60 = vmax.f32 %v961_v28, 0.0  ;;  %882 = vst [vmem:[#allocation10] sm:$0xff] %v834_v27 }
 0x220   : > { %1025 = vxpose.xlu2.b32.cont [13/16] (narrow) %v993_v60, 8 }
 0x221   : > { %1050 = vxpose.xlu0.b32.cont [6/16] (narrow) %v1002_v47, 8  ;;  %v898_v47 = vld [vmem:[#allocation2 + $0x168] sm:$0xff] }
 0x222   : > { %v930_v48 = vmul.f32 %v898_v47, %v1811_v4 }
 0x224   : > { %v962_v49 = vadd.f32 %v930_v48, %v1814_v8 }
 0x225   : > { %865 = vxpose.xlu1.b32.end [16/16] (narrow) %v817_v56, 8 }
 0x226   : > { %v994_v51 = vmax.f32 %v962_v49, 0.0 }
 0x228   : > { %1026 = vxpose.xlu2.b32.cont [14/16] (narrow) %v994_v51, 8 }
 0x229   : > { %1051 = vxpose.xlu0.b32.cont [7/16] (narrow) %v1003_v45, 8  ;;  %v899_v45 = vld [vmem:[#allocation2 + $0x170] sm:$0xff] }
 0x22a   : > { %v931_v57 = vmul.f32 %v899_v45, %v1811_v4 }
 0x22c   : > { %v963_v58 = vadd.f32 %v931_v57, %v1814_v8 }
 0x22e   : > { %v995_v63 = vmax.f32 %v963_v58, 0.0 }
 0x230   : > { %1027 = vxpose.xlu2.b32.cont [15/16] (narrow) %v995_v63, 8 }
 0x231   : > { %1052 = vxpose.xlu0.b32.cont [8/16] (narrow) %v1004_v35, 8  ;;  %v946_v35 = vmul.f32 %v914_v62, %v1811_v4 }
 0x233   : > { %v978_v3 = vadd.f32 %v946_v35, %v1814_v8 }
 0x235   : > { %v1010_v7 = vmax.f32 %v978_v3, 0.0 }
 0x238   : > { %1028 = vxpose.xlu2.b32.end [16/16] (narrow) %v996_v2, 8 }
 0x239   : > { %1053 = vxpose.xlu0.b32.cont [9/16] (narrow) %v1005_v13, 8 }
 0x241   : > { %1054 = vxpose.xlu0.b32.cont [10/16] (narrow) %v1006_v22, 8 }
 0x249   : > { %1055 = vxpose.xlu0.b32.cont [11/16] (narrow) %v1007_v40, 8 }
 0x251   : > { %1056 = vxpose.xlu0.b32.cont [12/16] (narrow) %v1008_v53, 8  ;;  %v866_v13 = vpop.trf.xlu1 }
 0x252   : > { %883 = vst [vmem:[#allocation10 + $0x8] sm:$0xff] %v866_v13 }
 0x259   : > { %1057 = vxpose.xlu0.b32.cont [13/16] (narrow) %v1009_v1, 8  ;;  %v1029_v14 = vpop.trf.xlu2 }
 0x25a   : > { %1078 = vst [vmem:[#allocation10 + $0x10] sm:$0xff] %v1029_v14 }
 0x261   : > { %1058 = vxpose.xlu0.b32.cont [14/16] (narrow) %v1010_v7, 8 }
 0x269   : > { %1059 = vxpose.xlu0.b32.cont [15/16] (narrow) %v1011_v10, 8 }
 0x271   : > { %1060 = vxpose.xlu0.b32.end [16/16] (narrow) %v1012_v5, 8 }
 0x29d   : > { %v1061_v15 = vpop.trf.xlu0 }
 0x29e   : > { %1079 = vst [vmem:[#allocation10 + $0x18] sm:$0xff] %v1061_v15 }
 0x29f PF: > { %p1336_p4 = scmp.eq.s32.totalorder %s1562_s19, 1  ;;  %s1515_s14 = smov [#allocation10]  }
 0x2a0   : > { %s1085_s15 = sshll.u32 %s1515_s14, 4  ;;  %s1087_s23 = sshll.u32 %s1964_s4, 4  ;;  %s1086_s15 = int_to_ptr.vmem [resolvable:$true] %s1085_s15  ;;  %s1088_s23 = int_to_ptr.hbm [resolvable:$true] %s1087_s23 }
 0x2a1   : > { %s1516_s25 = smov 256   ;;  %s1517_s18 = smov 16  }
 0x2a2   : > { %1322 = dma.vmem_to_hbm [thread:$0]  (%p1336_p4), %s1086_s15, 512, %s1088_s23, [#allocation7], %s1516_s25, %s1516_s25, %s1517_s18  }
 0x2a3   : > { %1492 = dma.done.wait (%p1336_p4), [#allocation7], 512  }
 0x2a4   : > { %1494 = vsyncadd (%p1336_p4), [#allocation7], 4294966784 }
 0x2a5 PF: > { %p16_p5 = scmp.ge.s32.totalorder %s1587_s27, 4   ;;  %s1968_s15 = smov %s1501_s16 }
 0x2a6   : > { %s1969_s16 = smov %s1505_s17  ;;  %s1970_s17 = smov %s1600_s6 }
 0x2a7   : > { %s1971_s18 = smov %s1587_s27  ;;  %18 = sbr.rel (!%p16_p5) target bundleno = 5 (0x5), region = 88 }
 0x2ac   :  { %1104 = vsyncpa [#allocation6], 1 }
 0x2ad   :  { %1106 = vsyncpa [#allocation6 + $0x1], 1 }
 0x2ae   :  { %1107 = vsyncpa [#allocation9], 1 }
 0x2af   :  { %1108 = vsyncpa [#allocation7], 1 }
 0x2b0   :  { %1110 = vsyncpa [#allocation7 + $0x1], 1 }

// kernel: tpu_custom_call.1
= control target key start
LH: loop header
LB: loop body
LE: loop exit
PB: predicated region body
PF: predicated region fallthrough
CT: control target
= control target key end

     0   :  { %9 = vsyncpa [#allocation6], 0  ;;  %s1960_s0 = inlined_call_operand.hbm [shape: bf16[512,128], index: 0, kind: input, shape index: {}]   ;;  %s1961_s1 = inlined_call_operand.hbm [shape: bf16[128,128], index: 1, kind: input, shape index: {}]   ;;  %s1962_s2 = inlined_call_operand.vmem [shape: f32[1,128], index: 2, kind: input, shape index: {}]   ;;  %s1963_s3 = inlined_call_operand.vmem [shape: f32[1,128], index: 3, kind: input, shape index: {}]   ;;  %s1964_s4 = inlined_call_operand.hbm [shape: f32[2,8,256], index: 4, kind: output, shape index: {}]  }
   0x1   :  { %11 = vsyncpa [#allocation6 + $0x1], 0 }
   0x2   :  { %12 = vsyncpa [#allocation9], 0 }
   0x3   :  { %13 = vsyncpa [#allocation7], 0  ;;  %s1543_s15 = smov 0   ;;  %s1545_s16 = smov 0  }
   0x4   :  { %s1547_s17 = smov 0   ;;  %s1549_s18 = smov 0  }
   0x5 LB: > { %s1562_s19 = sadd.s32 4294967295, %s1509_s18   ;;  %p39_p0 = scmp.ne.s32.totalorder %s1501_s16, %s1497_s15  ;;  %s1509_s18 = sphi %s1549_s18, %s1971_s18   ;;  %s1505_s17 = sphi %s1547_s17, %s1970_s17   ;;  %s1501_s16 = sphi %s1545_s16, %s1969_s16   ;;  %s1497_s15 = sphi %s1543_s15, %s1968_s15  }
   0x6   : > { %p40_p1 = scmp.eq.s32.totalorder %s1562_s19, 0  ;;  %p1154_p2 = scmp.ge.s32.totalorder %s1509_s18, 1 }
   0x7   : > { %p134_p3 = scmp.lt.s32.totalorder %s1509_s18, 3  ;;  %p1155_p4 = scmp.ne.s32.totalorder %s1562_s19, 0 }
   0x8   : > { %p1571_p5 = por %p40_p1, %p39_p0  ;;  %s145_s23 = sshll.u32 %s1961_s1, 4  ;;  %s146_s23 = int_to_ptr.hbm [resolvable:$true] %s145_s23 }
   0x9   : > { %p1578_p6 = pnand %p1154_p2, %p134_p3  ;;  %s1511_s25 = smov [#allocation8]  }
   0xa   : > { %s147_s26 = sshll.u32 %s1511_s25, 4  ;;  %s1587_s27 = sadd.s32 1, %s1509_s18   ;;  %s148_s26 = int_to_ptr.vmem [resolvable:$true] %s147_s26 }
   0xb   : > { %p1325_p7 = pneg %p1578_p6  ;;  %s1512_s28 = smov 64  }
   0xc   : > { %s1513_s29 = smov 4   ;;  %s23_s30 = ssub.s32 %s1509_s18, %s1587_s27 }
   0xd   : > { %p1326_p8 = pnand %p1325_p7, %p40_p1  ;;  %s26_s5 = sadd.s32 1, %s1505_s17 }
   0xe   : > { %p24_p9 = scmp.eq.s32.totalorder %s23_s30, 0  ;;  %p33_p10 = scmp.ne.s32.totalorder %s1505_s17, %s1501_s16 }
   0xf   : > { %1328 = dma.hbm_to_vmem [thread:$0]  (!%p1326_p8), %s146_s23, 1024, %s148_s26, [#allocation9], %s1512_s28, %s1512_s28, %s1513_s29  }
  0x10   : > { %p34_p11 = scmp.eq.s32.totalorder %s1509_s18, 0  ;;  %p1334_p12 = scmp.lt.s32.totalorder %s1509_s18, 2 }
  0x11   : > { %s1600_s6 = scalar_select %p24_p9, %s1505_s17, %s26_s5  }
  0x12   : > { %p35_p13 = por %p34_p11, %p33_p10  ;;  %s167_s7 = sand.u32 1, %s1505_s17  }
  0x13   : > { %s1157_s8 = sshll.u32 %s167_s7, 7  ;;  %s1266_s9 = sshll.u32 %s1509_s18, 7 }
  0x14   : > { %s176_s12 = scalar_lea.hbm %s1960_s0, %s1266_s9  ;;  %s171_s13 = scalar_lea.vmem [#allocation5], %s1157_s8 }
  0x15   : > { %s179_s14 = sshll.u32 %s171_s13, 4  ;;  %s177_s15 = sshll.u32 %s176_s12, 4  ;;  %s180_s14 = int_to_ptr.vmem [resolvable:$true] %s179_s14  ;;  %s178_s15 = int_to_ptr.hbm [resolvable:$true] %s177_s15 }
  0x16   : > { %p1607_p0 = pnand %p1334_p12, %p35_p13  ;;  %s168_s22 = scalar_lea.sflag [#allocation6], %s167_s7 }
  0x17   : > { %s1409_s23 = sshra.s32 %s178_s15, 4  ;;  %s1416_s30 = scalar_lea.hbm %s1960_s0, 256  ;;  %s1410_s23 = int_to_ptr.hbm [resolvable:$true] %s1409_s23 }
  0x18   : > { %s1411_s25 = scalar_lea.hbm %s1410_s23, 128  ;;  %p1413_p3 = pneg %p1607_p0 }
  0x19   : > { %p1412_p2 = scmp.ne.s32.totalorder %s1410_s23, %s1411_s25  ;;  %p1417_p9 = scmp.lt.s32.totalorder %s1410_s23, %s1960_s0 }
  0x1a   : > { %p1418_p10 = scmp.lt.s32.totalorder %s1416_s30, %s1411_s25 }
  0x1b   : > { %p1414_p7 = pnand %p1413_p3, %p1412_p2 }
  0x1c   : > { %p1419_p11 = por %p1418_p10, %p1417_p9 }
  0x1d   : > { %p1415_p8 = pneg %p1414_p7 }
  0x1f   : > { %p1420_p12 = pnand %p1419_p11, %p1415_p8 }
  0x21   : > { %1423 = shalt.err (!%p1420_p12)
}
  0x22   : > { %1332 = dma.hbm_to_vmem [thread:$0]  (!%p1607_p0), %s178_s15, 2048, %s180_s14, %s168_s22, %s1512_s28, %s1512_s28, %s1513_s29  }
  0x23   : > { %191 = sbr.rel (%p1578_p6) target bundleno = 677 (0x2a5), region = 36  ;;  %s193_s7 = sand.u32 (!%p1578_p6), 1, %s1501_s16  }
  0x24   : > { %s1161_s9 = sshll.u32 (!%p1578_p6), %s193_s7, 7  ;;  %s194_s10 = scalar_lea.sflag (!%p1578_p6), [#allocation6], %s193_s7 }
  0x25   : > { %s1627_s11 = scalar_lea.vmem (!%p1578_p6), [#allocation5], %s1161_s9 }
  0x28   : > { %1484 = dma.done.wait (%p1571_p5), %s194_s10, 2048  }
  0x29   : > { %1486 = vsyncadd (%p1571_p5), %s194_s10, 4294965248 }
  0x2a   : > { %1488 = dma.done.wait (%p40_p1), [#allocation9], 1024  }
  0x2b   : > { %1490 = vsyncadd (%p40_p1), [#allocation9], 4294966272  ;;  %227 = sbr.rel (%p1155_p4) target bundleno = 51 (0x33), region = 48 }
  0x30   : > { %v1514_v0 = vmov 0.0  }
  0x31   : > { %228 = vst [vmem:[#allocation3] sm:$0xff] %v1514_v0 }
  0x32   : > { %229 = vst [vmem:[#allocation4] sm:$0xff] %v1514_v0 }
  0x33 PF: > { %v1290_v1 = vld [vmem:[#allocation8 + $0x38] sm:$0xff]  ;;  %v1289_v2 = vld [vmem:[#allocation8 + $0x30] sm:$0xff]  ;;  %v1288_v3 = vld [vmem:[#allocation8 + $0x28] sm:$0xff]  ;;  %s1260_s20 = sshll.u32 %s1562_s19, 8  ;;  %p1261_p1 = scmp.ne.s32.totalorder %s1562_s19, 1 }
  0x34   : > { %422 = vmatpush.bf16.msra.mxu0 %v1290_v1  ;;  %1291 = vmatpush.bf16.msra.mxu1 %v1290_v1  ;;  %v1287_v4 = vld [vmem:[#allocation8 + $0x20] sm:$0xff]  ;;  %v1286_v5 = vld [vmem:[#allocation8 + $0x18] sm:$0xff]  ;;  %v1285_v6 = vld [vmem:[#allocation8 + $0x10] sm:$0xff]  ;;  %s1658_s24 = scalar_lea.vmem [#allocation2], %s1260_s20 }
  0x35   : > { %1292 = vmatpush.bf16.msra.mxu2 %v1290_v1  ;;  %1293 = vmatpush.bf16.msra.mxu3 %v1290_v1  ;;  %v1284_v7 = vld [vmem:[#allocation8 + $0x8] sm:$0xff]  ;;  %v1283_v8 = vld [vmem:[#allocation8] sm:$0xff]  ;;  %v1269_v17 = vld [vmem:[%s1627_s11 + $0x10] sm:$0xff] }
  0x36   : > { %v1267_v9 = vld [vmem:[%s1627_s11] sm:$0xff]  ;;  %v1268_v13 = vld [vmem:[%s1627_s11 + $0x8] sm:$0xff]  ;;  %v1273_v18 = vld [vmem:[%s1627_s11 + $0x30] sm:$0xff] }
  0x37   : > { %v1271_v10 = vld [vmem:[%s1627_s11 + $0x20] sm:$0xff]  ;;  %v1272_v14 = vld [vmem:[%s1627_s11 + $0x28] sm:$0xff]  ;;  %v1277_v19 = vld [vmem:[%s1627_s11 + $0x50] sm:$0xff] }
  0x38   : > { %423 = vmatpush.bf16.msra.mxu0 %v1289_v2  ;;  %1294 = vmatpush.bf16.msra.mxu1 %v1289_v2  ;;  %v1275_v11 = vld [vmem:[%s1627_s11 + $0x40] sm:$0xff]  ;;  %v1276_v15 = vld [vmem:[%s1627_s11 + $0x48] sm:$0xff]  ;;  %v1281_v20 = vld [vmem:[%s1627_s11 + $0x70] sm:$0xff] }
  0x39   : > { %1295 = vmatpush.bf16.msra.mxu2 %v1289_v2  ;;  %1296 = vmatpush.bf16.msra.mxu3 %v1289_v2  ;;  %v1279_v12 = vld [vmem:[%s1627_s11 + $0x60] sm:$0xff]  ;;  %v1280_v16 = vld [vmem:[%s1627_s11 + $0x68] sm:$0xff]  ;;  %v1270_v21 = vld [vmem:[%s1627_s11 + $0x18] sm:$0xff] }
  0x3a   : > { %v1274_v22 = vld [vmem:[%s1627_s11 + $0x38] sm:$0xff] }
  0x3b   : > { %v1278_v23 = vld [vmem:[%s1627_s11 + $0x58] sm:$0xff] }
  0x3c   : > { %424 = vmatpush.bf16.msra.mxu0 %v1288_v3  ;;  %1297 = vmatpush.bf16.msra.mxu1 %v1288_v3  ;;  %v1282_v24 = vld [vmem:[%s1627_s11 + $0x78] sm:$0xff] }
  0x3d   : > { %1298 = vmatpush.bf16.msra.mxu2 %v1288_v3  ;;  %1299 = vmatpush.bf16.msra.mxu3 %v1288_v3 }
  0x40   : > { %425 = vmatpush.bf16.msra.mxu0 %v1287_v4  ;;  %1300 = vmatpush.bf16.msra.mxu1 %v1287_v4 }
  0x41   : > { %1301 = vmatpush.bf16.msra.mxu2 %v1287_v4  ;;  %1302 = vmatpush.bf16.msra.mxu3 %v1287_v4 }
  0x44   : > { %426 = vmatpush.bf16.msra.mxu0 %v1286_v5  ;;  %1303 = vmatpush.bf16.msra.mxu1 %v1286_v5 }
  0x45   : > { %1304 = vmatpush.bf16.msra.mxu2 %v1286_v5  ;;  %1305 = vmatpush.bf16.msra.mxu3 %v1286_v5 }
  0x48   : > { %427 = vmatpush.bf16.msra.mxu0 %v1285_v6  ;;  %1306 = vmatpush.bf16.msra.mxu1 %v1285_v6 }
  0x49   : > { %1307 = vmatpush.bf16.msra.mxu2 %v1285_v6  ;;  %1308 = vmatpush.bf16.msra.mxu3 %v1285_v6 }
  0x4c   : > { %428 = vmatpush.bf16.msra.mxu0 %v1284_v7  ;;  %1309 = vmatpush.bf16.msra.mxu1 %v1284_v7 }
  0x4d   : > { %1310 = vmatpush.bf16.msra.mxu2 %v1284_v7  ;;  %1311 = vmatpush.bf16.msra.mxu3 %v1284_v7 }
  0x50   : > { %429 = vmatpush.bf16.msra.mxu0 %v1283_v8  ;;  %1312 = vmatpush.bf16.msra.mxu1 %v1283_v8 }
  0x51   : > { %1313 = vmatpush.bf16.msra.mxu2 %v1283_v8  ;;  %1314 = vmatpush.bf16.msra.mxu3 %v1283_v8 }
  0x53   : > { %430 = vmatmul.bf16.vlgmr.msra.gmra.mxu0 %v1267_v9  ;;  %450 = vmatmul.bf16.vlgmr.msra.gmra.mxu1 %v1271_v10 }
  0x54   : > { %470 = vmatmul.bf16.vlgmr.msra.gmra.mxu2 %v1275_v11  ;;  %490 = vmatmul.bf16.vlgmr.msra.gmra.mxu3 %v1279_v12 }
  0x63   : > { %435 = vmatmul.bf16.gmra.mxu0 %v1268_v13  ;;  %455 = vmatmul.bf16.gmra.mxu1 %v1272_v14 }
  0x64   : > { %475 = vmatmul.bf16.gmra.mxu2 %v1276_v15  ;;  %495 = vmatmul.bf16.gmra.mxu3 %v1280_v16 }
  0x73   : > { %440 = vmatmul.bf16.gmra.mxu0 %v1269_v17  ;;  %460 = vmatmul.bf16.gmra.mxu1 %v1273_v18 }
  0x74   : > { %480 = vmatmul.bf16.gmra.mxu2 %v1277_v19  ;;  %500 = vmatmul.bf16.gmra.mxu3 %v1281_v20 }
  0x83   : > { %445 = vmatmul.bf16.gmra.mxu0 %v1270_v21  ;;  %465 = vmatmul.bf16.gmra.mxu1 %v1274_v22 }
  0x84   : > { %485 = vmatmul.bf16.gmra.mxu2 %v1278_v23  ;;  %505 = vmatmul.bf16.gmra.mxu3 %v1282_v24 }
  0xd0   : > { %v431_v25 = vpop.f32.mrf.mxu0  ;;  %v1656_v26 = vpop.f32.mrf.mxu1 }
  0xd1   : > { %513 = vst [vmem:[%s1658_s24] sm:$0xff] %v431_v25  ;;  %v580_v48 = vmul.f32 %v431_v25, %v431_v25  ;;  %v588_v12 = vmul.f32 %v1656_v26, %v1656_v26 }
  0xd2   : > { %521 = vst [vmem:[%s1658_s24 + $0x40] sm:$0xff] %v1656_v26 }
  0xd7   : > { %v1663_v27 = vpop.f32.mrf.mxu2  ;;  %v1670_v30 = vpop.f32.mrf.mxu3 }
  0xd8   : > { %v433_v28 = vpop.f32.mrf.mxu0  ;;  %v1665_v29 = vpop.f32.mrf.mxu1  ;;  %529 = vst [vmem:[%s1658_s24 + $0x80] sm:$0xff] %v1663_v27 }
  0xd9   : > { %514 = vst [vmem:[%s1658_s24 + $0x8] sm:$0xff] %v433_v28  ;;  %v581_v47 = vmul.f32 %v433_v28, %v433_v28  ;;  %v546_v49 = vadd.f32 %v433_v28, %v431_v25  ;;  %v589_v15 = vmul.f32 %v1665_v29, %v1665_v29 }
  0xda   : > { %522 = vst [vmem:[%s1658_s24 + $0x48] sm:$0xff] %v1665_v29 }
  0xdb   : > { %537 = vst [vmem:[%s1658_s24 + $0xc0] sm:$0xff] %v1670_v30  ;;  %v612_v51 = vadd.f32 %v581_v47, %v580_v48 }
  0xdf   : > { %v1676_v31 = vpop.f32.mrf.mxu2  ;;  %v1683_v34 = vpop.f32.mrf.mxu3 }
  0xe0   : > { %v436_v32 = vpop.f32.mrf.mxu0  ;;  %v1678_v33 = vpop.f32.mrf.mxu1  ;;  %530 = vst [vmem:[%s1658_s24 + $0x88] sm:$0xff] %v1676_v31 }
  0xe1   : > { %515 = vst [vmem:[%s1658_s24 + $0x10] sm:$0xff] %v436_v32  ;;  %v582_v50 = vmul.f32 %v436_v32, %v436_v32  ;;  %v547_v52 = vadd.f32 %v546_v49, %v436_v32  ;;  %v590_v18 = vmul.f32 %v1678_v33, %v1678_v33 }
  0xe2   : > { %523 = vst [vmem:[%s1658_s24 + $0x50] sm:$0xff] %v1678_v33 }
  0xe3   : > { %538 = vst [vmem:[%s1658_s24 + $0xc8] sm:$0xff] %v1683_v34  ;;  %v613_v57 = vadd.f32 %v612_v51, %v582_v50  ;;  %v596_v50 = vmul.f32 %v1663_v27, %v1663_v27 }
  0xe7   : > { %v1689_v35 = vpop.f32.mrf.mxu2  ;;  %v1696_v38 = vpop.f32.mrf.mxu3 }
  0xe8   : > { %v438_v36 = vpop.f32.mrf.mxu0  ;;  %v1691_v37 = vpop.f32.mrf.mxu1  ;;  %531 = vst [vmem:[%s1658_s24 + $0x90] sm:$0xff] %v1689_v35 }
  0xe9   : > { %516 = vst [vmem:[%s1658_s24 + $0x18] sm:$0xff] %v438_v36  ;;  %v583_v53 = vmul.f32 %v438_v36, %v438_v36  ;;  %v548_v58 = vadd.f32 %v547_v52, %v438_v36  ;;  %v591_v22 = vmul.f32 %v1691_v37, %v1691_v37 }
  0xea   : > { %524 = vst [vmem:[%s1658_s24 + $0x58] sm:$0xff] %v1691_v37 }
  0xeb   : > { %539 = vst [vmem:[%s1658_s24 + $0xd0] sm:$0xff] %v1696_v38  ;;  %v614_v61 = vadd.f32 %v613_v57, %v583_v53 }
  0xef   : > { %v1702_v39 = vpop.f32.mrf.mxu2  ;;  %v1709_v42 = vpop.f32.mrf.mxu3 }
  0xf0   : > { %v441_v40 = vpop.f32.mrf.mxu0  ;;  %v1704_v41 = vpop.f32.mrf.mxu1  ;;  %532 = vst [vmem:[%s1658_s24 + $0x98] sm:$0xff] %v1702_v39 }
  0xf1   : > { %517 = vst [vmem:[%s1658_s24 + $0x20] sm:$0xff] %v441_v40  ;;  %v584_v59 = vmul.f32 %v441_v40, %v441_v40  ;;  %v549_v62 = vadd.f32 %v548_v58, %v441_v40  ;;  %v599_v58 = vmul.f32 %v1702_v39, %v1702_v39 }
  0xf2   : > { %525 = vst [vmem:[%s1658_s24 + $0x60] sm:$0xff] %v1704_v41 }
  0xf3   : > { %540 = vst [vmem:[%s1658_s24 + $0xd8] sm:$0xff] %v1709_v42  ;;  %v615_v0 = vadd.f32 %v614_v61, %v584_v59 }
  0xf7   : > { %v1715_v43 = vpop.f32.mrf.mxu2  ;;  %v1722_v46 = vpop.f32.mrf.mxu3 }
  0xf8   : > { %v443_v44 = vpop.f32.mrf.mxu0  ;;  %v1717_v45 = vpop.f32.mrf.mxu1  ;;  %533 = vst [vmem:[%s1658_s24 + $0xa0] sm:$0xff] %v1715_v43 }
  0xf9   : > { %518 = vst [vmem:[%s1658_s24 + $0x28] sm:$0xff] %v443_v44  ;;  %v585_v63 = vmul.f32 %v443_v44, %v443_v44  ;;  %v550_v1 = vadd.f32 %v549_v62, %v443_v44  ;;  %v593_v32 = vmul.f32 %v1717_v45, %v1717_v45 }
  0xfa   : > { %526 = vst [vmem:[%s1658_s24 + $0x68] sm:$0xff] %v1717_v45 }
  0xfb   : > { %541 = vst [vmem:[%s1658_s24 + $0xe0] sm:$0xff] %v1722_v46  ;;  %v616_v3 = vadd.f32 %v615_v0, %v585_v63 }
  0xff   : > { %v1728_v54 = vpop.f32.mrf.mxu2  ;;  %v1733_v60 = vpop.f32.mrf.mxu3 }
 0x100   : > { %v446_v55 = vpop.f32.mrf.mxu0  ;;  %v466_v56 = vpop.f32.mrf.mxu1  ;;  %534 = vst [vmem:[%s1658_s24 + $0xa8] sm:$0xff] %v1728_v54  ;;  %v601_v0 = vmul.f32 %v1728_v54, %v1728_v54 }
 0x101   : > { %519 = vst [vmem:[%s1658_s24 + $0x30] sm:$0xff] %v446_v55  ;;  %v586_v2 = vmul.f32 %v446_v55, %v446_v55  ;;  %v551_v4 = vadd.f32 %v550_v1, %v446_v55  ;;  %v594_v44 = vmul.f32 %v466_v56, %v466_v56 }
 0x102   : > { %527 = vst [vmem:[%s1658_s24 + $0x70] sm:$0xff] %v466_v56 }
 0x103   : > { %542 = vst [vmem:[%s1658_s24 + $0xe8] sm:$0xff] %v1733_v60  ;;  %v617_v8 = vadd.f32 %v616_v3, %v586_v2 }
 0x107   : > { %v486_v5 = vpop.f32.mrf.mxu2  ;;  %v1740_v11 = vpop.f32.mrf.mxu3 }
 0x108   : > { %v448_v6 = vpop.f32.mrf.mxu0  ;;  %v468_v7 = vpop.f32.mrf.mxu1  ;;  %535 = vst [vmem:[%s1658_s24 + $0xb0] sm:$0xff] %v486_v5  ;;  %v602_v3 = vmul.f32 %v486_v5, %v486_v5 }
 0x109   : > { %520 = vst [vmem:[%s1658_s24 + $0x38] sm:$0xff] %v448_v6  ;;  %v552_v9 = vadd.f32 %v551_v4, %v448_v6  ;;  %v587_v10 = vmul.f32 %v448_v6, %v448_v6 }
 0x10a   : > { %528 = vst [vmem:[%s1658_s24 + $0x78] sm:$0xff] %v468_v7 }
 0x10b   : > { %v553_v13 = vadd.f32 %v552_v9, %v1656_v26  ;;  %v618_v14 = vadd.f32 %v617_v8, %v587_v10  ;;  %543 = vst [vmem:[%s1658_s24 + $0xf0] sm:$0xff] %v1740_v11  ;;  %v592_v26 = vmul.f32 %v1704_v41, %v1704_v41 }
 0x10d   : > { %v554_v16 = vadd.f32 %v553_v13, %v1665_v29  ;;  %v619_v17 = vadd.f32 %v618_v14, %v588_v12  ;;  %v607_v14 = vmul.f32 %v1709_v42, %v1709_v42 }
 0x10f   : > { %v555_v19 = vadd.f32 %v554_v16, %v1678_v33  ;;  %v620_v20 = vadd.f32 %v619_v17, %v589_v15  ;;  %v488_v21 = vpop.f32.mrf.mxu2  ;;  %v508_v25 = vpop.f32.mrf.mxu3 }
 0x110   : > { %536 = vst [vmem:[%s1658_s24 + $0xb8] sm:$0xff] %v488_v21 }
 0x111   : > { %v621_v23 = vadd.f32 %v620_v20, %v590_v18  ;;  %v556_v24 = vadd.f32 %v555_v19, %v1691_v37  ;;  %544 = vst [vmem:[%s1658_s24 + $0xf8] sm:$0xff] %v508_v25  ;;  %v595_v37 = vmul.f32 %v468_v7, %v468_v7  ;;  %v609_v19 = vmul.f32 %v1733_v60, %v1733_v60 }
 0x113   : > { %v557_v28 = vadd.f32 %v556_v24, %v1704_v41  ;;  %v622_v29 = vadd.f32 %v621_v23, %v591_v22  ;;  %v597_v41 = vmul.f32 %v1676_v31, %v1676_v31  ;;  %v610_v22 = vmul.f32 %v1740_v11, %v1740_v11  ;;  %v545_v23 = vld [vmem:[#allocation3] sm:$0xff] }
 0x115   : > { %v558_v33 = vadd.f32 %v557_v28, %v1717_v45  ;;  %v623_v36 = vadd.f32 %v622_v29, %v592_v26  ;;  %v598_v45 = vmul.f32 %v1689_v35, %v1689_v35  ;;  %v611_v26 = vmul.f32 %v508_v25, %v508_v25  ;;  %v579_v28 = vld [vmem:[#allocation4] sm:$0xff] }
 0x117   : > { %v559_v40 = vadd.f32 %v558_v33, %v466_v56  ;;  %v624_v47 = vadd.f32 %v623_v36, %v593_v32 }
 0x119   : > { %v625_v48 = vadd.f32 %v624_v47, %v594_v44  ;;  %v560_v49 = vadd.f32 %v559_v40, %v468_v7  ;;  %v603_v7 = vmul.f32 %v488_v21, %v488_v21 }
 0x11b   : > { %v561_v51 = vadd.f32 %v560_v49, %v1663_v27  ;;  %v626_v52 = vadd.f32 %v625_v48, %v595_v37  ;;  %v600_v27 = vmul.f32 %v1715_v43, %v1715_v43 }
 0x11d   : > { %v562_v53 = vadd.f32 %v561_v51, %v1676_v31  ;;  %v627_v55 = vadd.f32 %v626_v52, %v596_v50 }
 0x11f   : > { %v563_v56 = vadd.f32 %v562_v53, %v1689_v35  ;;  %v628_v57 = vadd.f32 %v627_v55, %v597_v41 }
 0x121   : > { %v629_v59 = vadd.f32 %v628_v57, %v598_v45  ;;  %v564_v61 = vadd.f32 %v563_v56, %v1702_v39  ;;  %v604_v39 = vmul.f32 %v1670_v30, %v1670_v30 }
 0x123   : > { %v565_v62 = vadd.f32 %v564_v61, %v1715_v43  ;;  %v630_v63 = vadd.f32 %v629_v59, %v599_v58  ;;  %v605_v43 = vmul.f32 %v1683_v34, %v1683_v34 }
 0x125   : > { %v566_v31 = vadd.f32 %v565_v62, %v1728_v54  ;;  %v631_v1 = vadd.f32 %v630_v63, %v600_v27  ;;  %v606_v54 = vmul.f32 %v1696_v38, %v1696_v38 }
 0x127   : > { %v632_v35 = vadd.f32 %v631_v1, %v601_v0  ;;  %v567_v2 = vadd.f32 %v566_v31, %v486_v5 }
 0x129   : > { %v633_v4 = vadd.f32 %v632_v35, %v602_v3  ;;  %v568_v6 = vadd.f32 %v567_v2, %v488_v21 }
 0x12b   : > { %v569_v8 = vadd.f32 %v568_v6, %v1670_v30  ;;  %v634_v9 = vadd.f32 %v633_v4, %v603_v7  ;;  %v608_v30 = vmul.f32 %v1722_v46, %v1722_v46 }
 0x12d   : > { %v570_v10 = vadd.f32 %v569_v8, %v1683_v34  ;;  %v635_v12 = vadd.f32 %v634_v9, %v604_v39 }
 0x12f   : > { %v571_v5 = vadd.f32 %v570_v10, %v1696_v38  ;;  %v636_v13 = vadd.f32 %v635_v12, %v605_v43 }
 0x131   : > { %v637_v15 = vadd.f32 %v636_v13, %v606_v54  ;;  %v572_v16 = vadd.f32 %v571_v5, %v1709_v42 }
 0x133   : > { %v573_v17 = vadd.f32 %v572_v16, %v1722_v46  ;;  %v638_v18 = vadd.f32 %v637_v15, %v607_v14 }
 0x135   : > { %v574_v34 = vadd.f32 %v573_v17, %v1733_v60  ;;  %v639_v20 = vadd.f32 %v638_v18, %v608_v30 }
 0x137   : > { %v640_v38 = vadd.f32 %v639_v20, %v609_v19  ;;  %v575_v21 = vadd.f32 %v574_v34, %v1740_v11 }
 0x139   : > { %v641_v42 = vadd.f32 %v640_v38, %v610_v22  ;;  %v576_v24 = vadd.f32 %v575_v21, %v508_v25 }
 0x13b   : > { %v577_v29 = vadd.f32 %v576_v24, %v545_v23  ;;  %v642_v46 = vadd.f32 %v641_v42, %v611_v26  ;;  %648 = sbr.rel (%p1261_p1) target bundleno = 671 (0x29f), region = 52 }
 0x13d   : > { %578 = vst [vmem:[#allocation3] sm:$0xff] %v577_v29  ;;  %v643_v32 = vadd.f32 %v642_v46, %v579_v28 }
 0x13f   : > { %644 = vst [vmem:[#allocation4] sm:$0xff] %v643_v32 }
 0x140   : > { %v679_v31 = vld [vmem:[%s1962_s2] sm:$0x1]  ;;  %v685_v39 = vld [vmem:[#allocation2 + $0x8] sm:$0xff]  ;;  %v686_v54 = vld [vmem:[#allocation2 + $0x10] sm:$0xff] }
 0x141   : > { %v681_v35 = vld [vmem:[%s1963_s3] sm:$0x1]  ;;  %v687_v15 = vld [vmem:[#allocation2 + $0x18] sm:$0xff]  ;;  %v689_v38 = vld [vmem:[#allocation2 + $0x28] sm:$0xff] }
 0x142   : > { %v684_v2 = vld [vmem:[#allocation2] sm:$0xff]  ;;  %v690_v42 = vld [vmem:[#allocation2 + $0x30] sm:$0xff]  ;;  %v691_v29 = vld [vmem:[#allocation2 + $0x38] sm:$0xff] }
 0x143   : > { %v688_v18 = vld [vmem:[#allocation2 + $0x20] sm:$0xff] }
 0x144   : > { %v649_v60 = vld [vmem:[#allocation3] sm:$0xff] }
 0x145   : > { %v650_v36 = vrot.slane %v649_v60, 4 }
 0x146   : > { %v656_v33 = vld [vmem:[#allocation4] sm:$0xff] }
 0x147   : > { %v657_v40 = vrot.slane %v656_v33, 4  ;;  %v651_v44 = vadd.f32 %v650_v36, %v649_v60 }
 0x149   : > { %v658_v47 = vadd.f32 %v657_v40, %v656_v33  ;;  %v652_v11 = vrot.slane %v651_v44, 2  ;;  %v692_v33 = vld [vmem:[#allocation2 + $0x40] sm:$0xff] }
 0x14b   : > { %v659_v48 = vrot.slane %v658_v47, 2  ;;  %v653_v49 = vadd.f32 %v652_v11, %v651_v44 }
 0x14d   : > { %v660_v37 = vadd.f32 %v659_v48, %v658_v47  ;;  %v654_v25 = vrot.slane %v653_v49, 1  ;;  %v693_v47 = vld [vmem:[#allocation2 + $0x48] sm:$0xff] }
 0x14f   : > { %v661_v50 = vrot.slane %v660_v37, 1  ;;  %v655_v51 = vadd.f32 %v654_v25, %v653_v49 }
 0x151   : > { %v662_v52 = vadd.f32 %v661_v50, %v660_v37  ;;  %v663_v41 = vmul.f32 0.001953125, %v655_v51  ;;  %v694_v37 = vld [vmem:[#allocation2 + $0x50] sm:$0xff] }
 0x153   : > { %v664_v53 = vmul.f32 0.001953125, %v662_v52  ;;  %v665_v55 = vmul.f32 %v663_v41, %v663_v41  ;;  %v695_v52 = vld [vmem:[#allocation2 + $0x58] sm:$0xff] }
 0x155   : > { %v666_v45 = vsub.f32 %v664_v53, %v665_v55 }
 0x157   : > { %v667_v56 = vmax.f32 %v666_v45, 0.0  ;;  %v696_v45 = vld [vmem:[#allocation2 + $0x60] sm:$0xff] }
 0x159   : > { %v668_v57 = vadd.f32 1e-05, %v667_v56 }
 0x15b   : > { %1377 = vrsqrt.f32 %v668_v57  ;;  %vm675_vm0 = vweird.f32 %v668_v57 }
 0x161   : > { %v1378_v58 = vpop.eup %1377 }
 0x162   : > { %v670_v59 = vmul.f32 %v1378_v58, %v668_v57  ;;  %vm676_vm1 = vweird.f32 %v1378_v58 }
 0x163   : > { %vm677_vm2 = vmor %vm675_vm0, %vm676_vm1 }
 0x164   : > { %v671_v61 = vmul.f32 %v1378_v58, %v670_v59  ;;  %v700_v59 = vld [vmem:[#allocation2 + $0x80] sm:$0xff] }
 0x166   : > { %v672_v27 = vmul.f32 0.5, %v671_v61  ;;  %v697_v61 = vld [vmem:[#allocation2 + $0x68] sm:$0xff] }
 0x168   : > { %v673_v62 = vsub.f32 1.5, %v672_v27 }
 0x16a   : > { %v674_v63 = vmul.f32 %v1378_v58, %v673_v62 }
 0x16c   : > { %v678_v0 = vsel %vm677_vm2, %v1378_v58, %v674_v63 }
 0x16d   : > { %v680_v1 = vmul.f32 %v679_v31, %v678_v0 }
 0x16f   : > { %v682_v3 = vmul.f32 %v680_v1, %v663_v41  ;;  %v1811_v4 = vperm.slane %v680_v1, 0 }
 0x171   : > { %v683_v6 = vsub.f32 %v681_v35, %v682_v3  ;;  %v719_v7 = vmul.f32 %v1811_v4, %v684_v2  ;;  %v720_v43 = vmul.f32 %v1811_v4, %v685_v39  ;;  %v721_v13 = vmul.f32 %v1811_v4, %v686_v54  ;;  %v701_v35 = vld [vmem:[#allocation2 + $0x88] sm:$0xff]  ;;  %v698_v2 = vld [vmem:[#allocation2 + $0x70] sm:$0xff] }
 0x172   : > { %v722_v30 = vmul.f32 %v1811_v4, %v687_v15  ;;  %v723_v19 = vmul.f32 %v1811_v4, %v688_v18  ;;  %v724_v22 = vmul.f32 %v1811_v4, %v689_v38  ;;  %v725_v26 = vmul.f32 %v1811_v4, %v690_v42  ;;  %v886_v18 = vld [vmem:[#allocation2 + $0x108] sm:$0xff] }
 0x173   : > { %v1814_v8 = vperm.slane %v683_v6, 0  ;;  %v726_v32 = vmul.f32 %v1811_v4, %v691_v29  ;;  %v727_v40 = vmul.f32 %v1811_v4, %v692_v33  ;;  %v728_v48 = vmul.f32 %v1811_v4, %v693_v47  ;;  %v887_v29 = vld [vmem:[#allocation2 + $0x110] sm:$0xff] }
 0x174   : > { %v729_v50 = vmul.f32 %v1811_v4, %v694_v37  ;;  %v730_v53 = vmul.f32 %v1811_v4, %v695_v52  ;;  %v731_v57 = vmul.f32 %v1811_v4, %v696_v45  ;;  %v735_v27 = vmul.f32 %v1811_v4, %v700_v59  ;;  %v888_v37 = vld [vmem:[#allocation2 + $0x118] sm:$0xff]  ;;  %v889_v59 = vld [vmem:[#allocation2 + $0x120] sm:$0xff] }
 0x175   : > { %v754_v9 = vadd.f32 %v1814_v8, %v719_v7  ;;  %v755_v12 = vadd.f32 %v1814_v8, %v720_v43  ;;  %v756_v14 = vadd.f32 %v1814_v8, %v721_v13  ;;  %v757_v17 = vadd.f32 %v1814_v8, %v722_v30  ;;  %v699_v13 = vld [vmem:[#allocation2 + $0x78] sm:$0xff] }
 0x176   : > { %v758_v20 = vadd.f32 %v1814_v8, %v723_v19  ;;  %v759_v23 = vadd.f32 %v1814_v8, %v724_v22  ;;  %v760_v28 = vadd.f32 %v1814_v8, %v725_v26  ;;  %v761_v60 = vadd.f32 %v1814_v8, %v726_v32  ;;  %v901_v22 = vld [vmem:[#allocation2 + $0x180] sm:$0xff] }
 0x177   : > { %v786_v10 = vmax.f32 %v754_v9, 0.0  ;;  %v787_v5 = vmax.f32 %v755_v12, 0.0  ;;  %v788_v16 = vmax.f32 %v756_v14, 0.0  ;;  %v789_v34 = vmax.f32 %v757_v17, 0.0  ;;  %v885_v9 = vld [vmem:[#allocation2 + $0x100] sm:$0xff] }
 0x178   : > { %v790_v21 = vmax.f32 %v758_v20, 0.0  ;;  %v791_v24 = vmax.f32 %v759_v23, 0.0  ;;  %v792_v46 = vmax.f32 %v760_v28, 0.0  ;;  %v793_v36 = vmax.f32 %v761_v60, 0.0 }
 0x179   : > { %818 = vxpose.xlu0.b32.start [1/16] (narrow) %v786_v10, 8  ;;  %v762_v44 = vadd.f32 %v1814_v8, %v727_v40  ;;  %v763_v49 = vadd.f32 %v1814_v8, %v728_v48  ;;  %v764_v51 = vadd.f32 %v1814_v8, %v729_v50  ;;  %v765_v55 = vadd.f32 %v1814_v8, %v730_v53  ;;  %v902_v40 = vld [vmem:[#allocation2 + $0x188] sm:$0xff]  ;;  %v903_v53 = vld [vmem:[#allocation2 + $0x190] sm:$0xff] }
 0x17a   : > { %v766_v58 = vadd.f32 %v1814_v8, %v731_v57  ;;  %v770_v62 = vadd.f32 %v1814_v8, %v735_v27  ;;  %v732_v31 = vmul.f32 %v1811_v4, %v697_v61  ;;  %v736_v3 = vmul.f32 %v1811_v4, %v701_v35 }
 0x17b   : > { %v794_v11 = vmax.f32 %v762_v44, 0.0  ;;  %v795_v25 = vmax.f32 %v763_v49, 0.0  ;;  %v796_v41 = vmax.f32 %v764_v51, 0.0  ;;  %v797_v56 = vmax.f32 %v765_v55, 0.0 }
 0x17c   : > { %v798_v63 = vmax.f32 %v766_v58, 0.0  ;;  %v802_v0 = vmax.f32 %v770_v62, 0.0  ;;  %v767_v1 = vadd.f32 %v1814_v8, %v732_v31  ;;  %v771_v6 = vadd.f32 %v1814_v8, %v736_v3  ;;  %v706_v31 = vld [vmem:[#allocation2 + $0xb0] sm:$0xff] }
 0x17d   : > { %v733_v39 = vmul.f32 %v1811_v4, %v698_v2  ;;  %v917_v10 = vmul.f32 %v885_v9, %v1811_v4  ;;  %v734_v17 = vmul.f32 %v1811_v4, %v699_v13  ;;  %v918_v19 = vmul.f32 %v886_v18, %v1811_v4 }
 0x17e   : > { %850 = vxpose.xlu1.b32.start [1/16] (narrow) %v802_v0, 8  ;;  %v799_v7 = vmax.f32 %v767_v1, 0.0  ;;  %v803_v43 = vmax.f32 %v771_v6, 0.0  ;;  %v933_v28 = vmul.f32 %v901_v22, %v1811_v4  ;;  %v919_v32 = vmul.f32 %v887_v29, %v1811_v4  ;;  %v904_v0 = vld [vmem:[#allocation2 + $0x198] sm:$0xff] }
 0x17f   : > { %v949_v12 = vadd.f32 %v917_v10, %v1814_v8  ;;  %v768_v54 = vadd.f32 %v1814_v8, %v733_v39  ;;  %v950_v20 = vadd.f32 %v918_v19, %v1814_v8  ;;  %v769_v38 = vadd.f32 %v1814_v8, %v734_v17 }
 0x180   : > { %v951_v60 = vadd.f32 %v919_v32, %v1814_v8  ;;  %v965_v33 = vadd.f32 %v933_v28, %v1814_v8  ;;  %v934_v49 = vmul.f32 %v902_v40, %v1811_v4  ;;  %v920_v50 = vmul.f32 %v888_v37, %v1811_v4 }
 0x181   : > { %819 = vxpose.xlu0.b32.cont [2/16] (narrow) %v787_v5, 8  ;;  %v702_v5 = vld [vmem:[#allocation2 + $0x90] sm:$0xff]  ;;  %v981_v14 = vmax.f32 %v949_v12, 0.0  ;;  %v800_v30 = vmax.f32 %v768_v54, 0.0  ;;  %v982_v23 = vmax.f32 %v950_v20, 0.0  ;;  %v801_v26 = vmax.f32 %v769_v38, 0.0 }
 0x182   : > { %v737_v15 = vmul.f32 %v1811_v4, %v702_v5  ;;  %v983_v44 = vmax.f32 %v951_v60, 0.0  ;;  %v997_v48 = vmax.f32 %v965_v33, 0.0  ;;  %v952_v51 = vadd.f32 %v920_v50, %v1814_v8  ;;  %v707_v12 = vld [vmem:[#allocation2 + $0xb8] sm:$0xff]  ;;  %v905_v54 = vld [vmem:[#allocation2 + $0x1a0] sm:$0xff]  ;;  %v906_v38 = vld [vmem:[#allocation2 + $0x1a8] sm:$0xff] }
 0x183   : > { %1013 = vxpose.xlu2.b32.start [1/16] (narrow) %v981_v14, 8  ;;  %v966_v52 = vadd.f32 %v934_v49, %v1814_v8  ;;  %v935_v58 = vmul.f32 %v903_v53, %v1811_v4  ;;  %v921_v27 = vmul.f32 %v889_v59, %v1811_v4  ;;  %v741_v35 = vmul.f32 %v1811_v4, %v706_v31  ;;  %v708_v20 = vld [vmem:[#allocation2 + $0xc0] sm:$0xff]  ;;  %v709_v60 = vld [vmem:[#allocation2 + $0xc8] sm:$0xff]  ;;  %v907_v33 = vld [vmem:[#allocation2 + $0x1b0] sm:$0xff] }
 0x184   : > { %v984_v55 = vmax.f32 %v952_v51, 0.0  ;;  %v936_v6 = vmul.f32 %v904_v0, %v1811_v4  ;;  %v742_v13 = vmul.f32 %v1811_v4, %v707_v12  ;;  %v743_v22 = vmul.f32 %v1811_v4, %v708_v20  ;;  %v710_v51 = vld [vmem:[#allocation2 + $0xd0] sm:$0xff] }
 0x185   : > { %v998_v57 = vmax.f32 %v966_v52, 0.0  ;;  %v953_v62 = vadd.f32 %v921_v27, %v1814_v8  ;;  %v776_v2 = vadd.f32 %v1814_v8, %v741_v35  ;;  %v744_v40 = vmul.f32 %v1811_v4, %v709_v60  ;;  %v908_v52 = vld [vmem:[#allocation2 + $0x1b8] sm:$0xff] }
 0x186   : > { %851 = vxpose.xlu1.b32.cont [2/16] (narrow) %v803_v43, 8  ;;  %v968_v10 = vadd.f32 %v936_v6, %v1814_v8  ;;  %v777_v14 = vadd.f32 %v1814_v8, %v742_v13  ;;  %v745_v53 = vmul.f32 %v1811_v4, %v710_v51 }
 0x187   : > { %v985_v1 = vmax.f32 %v953_v62, 0.0  ;;  %v808_v39 = vmax.f32 %v776_v2, 0.0  ;;  %v711_v62 = vld [vmem:[#allocation2 + $0xd8] sm:$0xff] }
 0x188   : > { %v809_v17 = vmax.f32 %v777_v14, 0.0  ;;  %v746_v0 = vmul.f32 %v1811_v4, %v711_v62  ;;  %v914_v62 = vld [vmem:[#allocation2 + $0x1e8] sm:$0xff] }
 0x189   : > { %820 = vxpose.xlu0.b32.cont [3/16] (narrow) %v788_v16, 8  ;;  %v772_v16 = vadd.f32 %v1814_v8, %v737_v15  ;;  %v1000_v15 = vmax.f32 %v968_v10, 0.0  ;;  %v910_v10 = vld [vmem:[#allocation2 + $0x1c8] sm:$0xff] }
 0x18a   : > { %v942_v14 = vmul.f32 %v910_v10, %v1811_v4 }
 0x18b   : > { %1014 = vxpose.xlu2.b32.cont [2/16] (narrow) %v982_v23, 8  ;;  %v778_v23 = vadd.f32 %v1814_v8, %v743_v22 }
 0x18d   : > { %v810_v28 = vmax.f32 %v778_v23, 0.0 }
 0x191   : > { %821 = vxpose.xlu0.b32.cont [4/16] (narrow) %v789_v34, 8  ;;  %v804_v34 = vmax.f32 %v772_v16, 0.0  ;;  %v937_v16 = vmul.f32 %v905_v54, %v1811_v4 }
 0x193   : > { %852 = vxpose.xlu1.b32.cont [3/16] (narrow) %v804_v34, 8  ;;  %1015 = vxpose.xlu2.b32.cont [3/16] (narrow) %v983_v44, 8  ;;  %v969_v19 = vadd.f32 %v937_v16, %v1814_v8  ;;  %v779_v44 = vadd.f32 %v1814_v8, %v744_v40 }
 0x195   : > { %v811_v49 = vmax.f32 %v779_v44, 0.0 }
 0x199   : > { %822 = vxpose.xlu0.b32.cont [5/16] (narrow) %v790_v21, 8  ;;  %v703_v21 = vld [vmem:[#allocation2 + $0x98] sm:$0xff] }
 0x19a   : > { %v738_v42 = vmul.f32 %v1811_v4, %v703_v21 }
 0x19b   : > { %1016 = vxpose.xlu2.b32.cont [4/16] (narrow) %v984_v55, 8  ;;  %v780_v55 = vadd.f32 %v1814_v8, %v745_v53 }
 0x1a1   : > { %823 = vxpose.xlu0.b32.cont [6/16] (narrow) %v791_v24, 8  ;;  %v773_v24 = vadd.f32 %v1814_v8, %v738_v42  ;;  %v1001_v42 = vmax.f32 %v969_v19, 0.0  ;;  %v911_v19 = vld [vmem:[#allocation2 + $0x1d0] sm:$0xff] }
 0x1a2   : > { %v943_v23 = vmul.f32 %v911_v19, %v1811_v4 }
 0x1a3   : > { %1017 = vxpose.xlu2.b32.cont [5/16] (narrow) %v985_v1, 8  ;;  %v781_v1 = vadd.f32 %v1814_v8, %v746_v0 }
 0x1a5   : > { %v813_v6 = vmax.f32 %v781_v1, 0.0 }
 0x1a9   : > { %824 = vxpose.xlu0.b32.cont [7/16] (narrow) %v792_v46, 8  ;;  %v805_v46 = vmax.f32 %v773_v24, 0.0  ;;  %v938_v24 = vmul.f32 %v906_v38, %v1811_v4 }
 0x1ab   : > { %853 = vxpose.xlu1.b32.cont [4/16] (narrow) %v805_v46, 8  ;;  %v970_v32 = vadd.f32 %v938_v24, %v1814_v8 }
 0x1b1   : > { %825 = vxpose.xlu0.b32.cont [8/16] (narrow) %v793_v36, 8  ;;  %v704_v36 = vld [vmem:[#allocation2 + $0xa0] sm:$0xff] }
 0x1b2   : > { %v739_v47 = vmul.f32 %v1811_v4, %v704_v36 }
 0x1b9   : > { %826 = vxpose.xlu0.b32.cont [9/16] (narrow) %v794_v11, 8  ;;  %v774_v11 = vadd.f32 %v1814_v8, %v739_v47  ;;  %v1002_v47 = vmax.f32 %v970_v32, 0.0  ;;  %v912_v32 = vld [vmem:[#allocation2 + $0x1d8] sm:$0xff] }
 0x1ba   : > { %v944_v44 = vmul.f32 %v912_v32, %v1811_v4 }
 0x1c1   : > { %827 = vxpose.xlu0.b32.cont [10/16] (narrow) %v795_v25, 8  ;;  %v806_v25 = vmax.f32 %v774_v11, 0.0  ;;  %v939_v11 = vmul.f32 %v907_v33, %v1811_v4 }
 0x1c3   : > { %854 = vxpose.xlu1.b32.cont [5/16] (narrow) %v806_v25, 8  ;;  %v971_v50 = vadd.f32 %v939_v11, %v1814_v8 }
 0x1c9   : > { %828 = vxpose.xlu0.b32.cont [11/16] (narrow) %v796_v41, 8  ;;  %v705_v41 = vld [vmem:[#allocation2 + $0xa8] sm:$0xff] }
 0x1ca   : > { %v740_v45 = vmul.f32 %v1811_v4, %v705_v41 }
 0x1d1   : > { %829 = vxpose.xlu0.b32.cont [12/16] (narrow) %v797_v56, 8  ;;  %v775_v56 = vadd.f32 %v1814_v8, %v740_v45  ;;  %v1003_v45 = vmax.f32 %v971_v50, 0.0  ;;  %v913_v50 = vld [vmem:[#allocation2 + $0x1e0] sm:$0xff] }
 0x1d3   : > { %v807_v61 = vmax.f32 %v775_v56, 0.0  ;;  %v940_v56 = vmul.f32 %v908_v52, %v1811_v4 }
 0x1d5   : > { %855 = vxpose.xlu1.b32.cont [6/16] (narrow) %v807_v61, 8  ;;  %v972_v27 = vadd.f32 %v940_v56, %v1814_v8 }
 0x1d7   : > { %v1004_v35 = vmax.f32 %v972_v27, 0.0 }
 0x1d9   : > { %830 = vxpose.xlu0.b32.cont [13/16] (narrow) %v798_v63, 8  ;;  %v967_v63 = vadd.f32 %v935_v58, %v1814_v8  ;;  %v812_v58 = vmax.f32 %v780_v55, 0.0  ;;  %v945_v55 = vmul.f32 %v913_v50, %v1811_v4 }
 0x1db   : > { %v999_v3 = vmax.f32 %v967_v63, 0.0  ;;  %v909_v63 = vld [vmem:[#allocation2 + $0x1c0] sm:$0xff] }
 0x1dc   : > { %v941_v2 = vmul.f32 %v909_v63, %v1811_v4 }
 0x1dd   : > { %856 = vxpose.xlu1.b32.cont [7/16] (narrow) %v808_v39, 8 }
 0x1e1   : > { %831 = vxpose.xlu0.b32.cont [14/16] (narrow) %v799_v7, 8  ;;  %v890_v7 = vld [vmem:[#allocation2 + $0x128] sm:$0xff] }
 0x1e2   : > { %v922_v9 = vmul.f32 %v890_v7, %v1811_v4 }
 0x1e4   : > { %v954_v43 = vadd.f32 %v922_v9, %v1814_v8  ;;  %v973_v9 = vadd.f32 %v941_v2, %v1814_v8 }
 0x1e5   : > { %857 = vxpose.xlu1.b32.cont [8/16] (narrow) %v809_v17, 8 }
 0x1e6   : > { %v986_v5 = vmax.f32 %v954_v43, 0.0  ;;  %v712_v43 = vld [vmem:[#allocation2 + $0xe0] sm:$0xff]  ;;  %v1005_v13 = vmax.f32 %v973_v9, 0.0 }
 0x1e7   : > { %v747_v54 = vmul.f32 %v1811_v4, %v712_v43  ;;  %v916_v43 = vld [vmem:[#allocation2 + $0x1f8] sm:$0xff] }
 0x1e8   : > { %1018 = vxpose.xlu2.b32.cont [6/16] (narrow) %v986_v5, 8 }
 0x1e9   : > { %832 = vxpose.xlu0.b32.cont [15/16] (narrow) %v800_v30, 8  ;;  %v891_v30 = vld [vmem:[#allocation2 + $0x130] sm:$0xff]  ;;  %v782_v5 = vadd.f32 %v1814_v8, %v747_v54 }
 0x1ea   : > { %v923_v18 = vmul.f32 %v891_v30, %v1811_v4 }
 0x1eb   : > { %v814_v16 = vmax.f32 %v782_v5, 0.0 }
 0x1ec   : > { %v955_v34 = vadd.f32 %v923_v18, %v1814_v8  ;;  %v974_v18 = vadd.f32 %v942_v14, %v1814_v8 }
 0x1ed   : > { %858 = vxpose.xlu1.b32.cont [9/16] (narrow) %v810_v28, 8 }
 0x1ee   : > { %v987_v21 = vmax.f32 %v955_v34, 0.0  ;;  %v713_v34 = vld [vmem:[#allocation2 + $0xe8] sm:$0xff]  ;;  %v1006_v22 = vmax.f32 %v974_v18, 0.0 }
 0x1ef   : > { %v748_v38 = vmul.f32 %v1811_v4, %v713_v34 }
 0x1f0   : > { %1019 = vxpose.xlu2.b32.cont [7/16] (narrow) %v987_v21, 8 }
 0x1f1   : > { %833 = vxpose.xlu0.b32.end [16/16] (narrow) %v801_v26, 8  ;;  %v892_v26 = vld [vmem:[#allocation2 + $0x138] sm:$0xff]  ;;  %v783_v21 = vadd.f32 %v1814_v8, %v748_v38 }
 0x1f2   : > { %v924_v29 = vmul.f32 %v892_v26, %v1811_v4 }
 0x1f3   : > { %v815_v24 = vmax.f32 %v783_v21, 0.0 }
 0x1f4   : > { %v956_v46 = vadd.f32 %v924_v29, %v1814_v8  ;;  %v975_v29 = vadd.f32 %v943_v23, %v1814_v8 }
 0x1f5   : > { %859 = vxpose.xlu1.b32.cont [10/16] (narrow) %v811_v49, 8 }
 0x1f6   : > { %v988_v36 = vmax.f32 %v956_v46, 0.0  ;;  %v714_v46 = vld [vmem:[#allocation2 + $0xf0] sm:$0xff]  ;;  %v1007_v40 = vmax.f32 %v975_v29, 0.0 }
 0x1f7   : > { %v749_v33 = vmul.f32 %v1811_v4, %v714_v46 }
 0x1f8   : > { %1020 = vxpose.xlu2.b32.cont [8/16] (narrow) %v988_v36, 8 }
 0x1f9   : > { %1045 = vxpose.xlu0.b32.start [1/16] (narrow) %v997_v48, 8  ;;  %v893_v48 = vld [vmem:[#allocation2 + $0x140] sm:$0xff]  ;;  %v784_v36 = vadd.f32 %v1814_v8, %v749_v33 }
 0x1fa   : > { %v925_v37 = vmul.f32 %v893_v48, %v1811_v4 }
 0x1fb   : > { %v816_v11 = vmax.f32 %v784_v36, 0.0 }
 0x1fc   : > { %v957_v25 = vadd.f32 %v925_v37, %v1814_v8  ;;  %v976_v37 = vadd.f32 %v944_v44, %v1814_v8 }
 0x1fd   : > { %860 = vxpose.xlu1.b32.cont [11/16] (narrow) %v812_v58, 8 }
 0x1fe   : > { %v989_v41 = vmax.f32 %v957_v25, 0.0  ;;  %v715_v25 = vld [vmem:[#allocation2 + $0xf8] sm:$0xff]  ;;  %v1008_v53 = vmax.f32 %v976_v37, 0.0 }
 0x1ff   : > { %v750_v52 = vmul.f32 %v1811_v4, %v715_v25 }
 0x200   : > { %1021 = vxpose.xlu2.b32.cont [9/16] (narrow) %v989_v41, 8 }
 0x201   : > { %1046 = vxpose.xlu0.b32.cont [2/16] (narrow) %v998_v57, 8  ;;  %v894_v57 = vld [vmem:[#allocation2 + $0x148] sm:$0xff]  ;;  %v785_v41 = vadd.f32 %v1814_v8, %v750_v52 }
 0x202   : > { %v926_v59 = vmul.f32 %v894_v57, %v1811_v4 }
 0x203   : > { %v817_v56 = vmax.f32 %v785_v41, 0.0 }
 0x204   : > { %v958_v61 = vadd.f32 %v926_v59, %v1814_v8  ;;  %v977_v59 = vadd.f32 %v945_v55, %v1814_v8 }
 0x205   : > { %861 = vxpose.xlu1.b32.cont [12/16] (narrow) %v813_v6, 8  ;;  %v915_v6 = vld [vmem:[#allocation2 + $0x1f0] sm:$0xff] }
 0x206   : > { %v990_v31 = vmax.f32 %v958_v61, 0.0  ;;  %v900_v61 = vld [vmem:[#allocation2 + $0x178] sm:$0xff]  ;;  %v1009_v1 = vmax.f32 %v977_v59, 0.0 }
 0x208   : > { %1022 = vxpose.xlu2.b32.cont [10/16] (narrow) %v990_v31, 8  ;;  %v932_v31 = vmul.f32 %v900_v61, %v1811_v4 }
 0x209   : > { %1047 = vxpose.xlu0.b32.cont [3/16] (narrow) %v999_v3, 8  ;;  %v895_v3 = vld [vmem:[#allocation2 + $0x150] sm:$0xff] }
 0x20a   : > { %v927_v7 = vmul.f32 %v895_v3, %v1811_v4  ;;  %v964_v0 = vadd.f32 %v932_v31, %v1814_v8 }
 0x20c   : > { %v959_v39 = vadd.f32 %v927_v7, %v1814_v8  ;;  %v996_v2 = vmax.f32 %v964_v0, 0.0 }
 0x20d   : > { %862 = vxpose.xlu1.b32.cont [13/16] (narrow) %v814_v16, 8 }
 0x20e   : > { %v991_v12 = vmax.f32 %v959_v39, 0.0  ;;  %v947_v39 = vmul.f32 %v915_v6, %v1811_v4 }
 0x210   : > { %1023 = vxpose.xlu2.b32.cont [11/16] (narrow) %v991_v12, 8  ;;  %v979_v9 = vadd.f32 %v947_v39, %v1814_v8  ;;  %v948_v12 = vmul.f32 %v916_v43, %v1811_v4 }
 0x211   : > { %1048 = vxpose.xlu0.b32.cont [4/16] (narrow) %v1000_v15, 8  ;;  %v896_v15 = vld [vmem:[#allocation2 + $0x158] sm:$0xff] }
 0x212   : > { %v928_v30 = vmul.f32 %v896_v15, %v1811_v4  ;;  %v1011_v10 = vmax.f32 %v979_v9, 0.0  ;;  %v980_v54 = vadd.f32 %v948_v12, %v1814_v8 }
 0x214   : > { %v960_v17 = vadd.f32 %v928_v30, %v1814_v8  ;;  %v1012_v5 = vmax.f32 %v980_v54, 0.0 }
 0x215   : > { %863 = vxpose.xlu1.b32.cont [14/16] (narrow) %v815_v24, 8 }
 0x216   : > { %v992_v20 = vmax.f32 %v960_v17, 0.0 }
 0x218   : > { %1024 = vxpose.xlu2.b32.cont [12/16] (narrow) %v992_v20, 8 }
 0x219   : > { %1049 = vxpose.xlu0.b32.cont [5/16] (narrow) %v1001_v42, 8  ;;  %v897_v42 = vld [vmem:[#allocation2 + $0x160] sm:$0xff] }
 0x21a   : > { %v929_v26 = vmul.f32 %v897_v42, %v1811_v4 }
 0x21c   : > { %v961_v28 = vadd.f32 %v929_v26, %v1814_v8 }
 0x21d   : > { %864 = vxpose.xlu1.b32.cont [15/16] (narrow) %v816_v11, 8  ;;  %v834_v27 = vpop.trf.xlu0 }
 0x21e   : > { %v993_v60 = vmax.f32 %v961_v28, 0.0  ;;  %882 = vst [vmem:[#allocation10] sm:$0xff] %v834_v27 }
 0x220   : > { %1025 = vxpose.xlu2.b32.cont [13/16] (narrow) %v993_v60, 8 }
 0x221   : > { %1050 = vxpose.xlu0.b32.cont [6/16] (narrow) %v1002_v47, 8  ;;  %v898_v47 = vld [vmem:[#allocation2 + $0x168] sm:$0xff] }
 0x222   : > { %v930_v48 = vmul.f32 %v898_v47, %v1811_v4 }
 0x224   : > { %v962_v49 = vadd.f32 %v930_v48, %v1814_v8 }
 0x225   : > { %865 = vxpose.xlu1.b32.end [16/16] (narrow) %v817_v56, 8 }
 0x226   : > { %v994_v51 = vmax.f32 %v962_v49, 0.0 }
 0x228   : > { %1026 = vxpose.xlu2.b32.cont [14/16] (narrow) %v994_v51, 8 }
 0x229   : > { %1051 = vxpose.xlu0.b32.cont [7/16] (narrow) %v1003_v45, 8  ;;  %v899_v45 = vld [vmem:[#allocation2 + $0x170] sm:$0xff] }
 0x22a   : > { %v931_v57 = vmul.f32 %v899_v45, %v1811_v4 }
 0x22c   : > { %v963_v58 = vadd.f32 %v931_v57, %v1814_v8 }
 0x22e   : > { %v995_v63 = vmax.f32 %v963_v58, 0.0 }
 0x230   : > { %1027 = vxpose.xlu2.b32.cont [15/16] (narrow) %v995_v63, 8 }
 0x231   : > { %1052 = vxpose.xlu0.b32.cont [8/16] (narrow) %v1004_v35, 8  ;;  %v946_v35 = vmul.f32 %v914_v62, %v1811_v4 }
 0x233   : > { %v978_v3 = vadd.f32 %v946_v35, %v1814_v8 }
 0x235   : > { %v1010_v7 = vmax.f32 %v978_v3, 0.0 }
 0x238   : > { %1028 = vxpose.xlu2.b32.end [16/16] (narrow) %v996_v2, 8 }
 0x239   : > { %1053 = vxpose.xlu0.b32.cont [9/16] (narrow) %v1005_v13, 8 }
 0x241   : > { %1054 = vxpose.xlu0.b32.cont [10/16] (narrow) %v1006_v22, 8 }
 0x249   : > { %1055 = vxpose.xlu0.b32.cont [11/16] (narrow) %v1007_v40, 8 }
 0x251   : > { %1056 = vxpose.xlu0.b32.cont [12/16] (narrow) %v1008_v53, 8  ;;  %v866_v13 = vpop.trf.xlu1 }
 0x252   : > { %883 = vst [vmem:[#allocation10 + $0x8] sm:$0xff] %v866_v13 }
 0x259   : > { %1057 = vxpose.xlu0.b32.cont [13/16] (narrow) %v1009_v1, 8  ;;  %v1029_v14 = vpop.trf.xlu2 }
 0x25a   : > { %1078 = vst [vmem:[#allocation10 + $0x10] sm:$0xff] %v1029_v14 }
 0x261   : > { %1058 = vxpose.xlu0.b32.cont [14/16] (narrow) %v1010_v7, 8 }
 0x269   : > { %1059 = vxpose.xlu0.b32.cont [15/16] (narrow) %v1011_v10, 8 }
 0x271   : > { %1060 = vxpose.xlu0.b32.end [16/16] (narrow) %v1012_v5, 8 }
 0x29d   : > { %v1061_v15 = vpop.trf.xlu0 }
 0x29e   : > { %1079 = vst [vmem:[#allocation10 + $0x18] sm:$0xff] %v1061_v15 }
 0x29f PF: > { %p1336_p4 = scmp.eq.s32.totalorder %s1562_s19, 1  ;;  %s1515_s14 = smov [#allocation10]  }
 0x2a0   : > { %s1085_s15 = sshll.u32 %s1515_s14, 4  ;;  %s1087_s23 = sshll.u32 %s1964_s4, 4  ;;  %s1086_s15 = int_to_ptr.vmem [resolvable:$true] %s1085_s15  ;;  %s1088_s23 = int_to_ptr.hbm [resolvable:$true] %s1087_s23 }
 0x2a1   : > { %s1516_s25 = smov 256   ;;  %s1517_s18 = smov 16  }
 0x2a2   : > { %1322 = dma.vmem_to_hbm [thread:$0]  (%p1336_p4), %s1086_s15, 512, %s1088_s23, [#allocation7], %s1516_s25, %s1516_s25, %s1517_s18  }
 0x2a3   : > { %1492 = dma.done.wait (%p1336_p4), [#allocation7], 512  }
 0x2a4   : > { %1494 = vsyncadd (%p1336_p4), [#allocation7], 4294966784 }
 0x2a5 PF: > { %p16_p5 = scmp.ge.s32.totalorder %s1587_s27, 4   ;;  %s1968_s15 = smov %s1501_s16 }
 0x2a6   : > { %s1969_s16 = smov %s1505_s17  ;;  %s1970_s17 = smov %s1600_s6 }
 0x2a7   : > { %s1971_s18 = smov %s1587_s27  ;;  %18 = sbr.rel (!%p16_p5) target bundleno = 5 (0x5), region = 88 }
 0x2ac   :  { %1104 = vsyncpa [#allocation6], 1 }
 0x2ad   :  { %1106 = vsyncpa [#allocation6 + $0x1], 1 }
 0x2ae   :  { %1107 = vsyncpa [#allocation9], 1 }
 0x2af   :  { %1108 = vsyncpa [#allocation7], 1 }
 0x2b0   :  { %1110 = vsyncpa [#allocation7 + $0x1], 1 }

</bundles_post_ra>
